<compile_context>
chip_gen: v5e
topology: v5e:2x2
jax: 0.10.0
libtpu: 0.0.40
codegen_flags: <defaults>
</compile_context>

<pallas_src>
import math

import jax
import jax.numpy as jnp
from jax.experimental import pallas as pl
from jax.experimental.pallas import tpu as pltpu

# ---- small synthetic BERT config (stands in for bert-base-cased) ----
VOCAB = 100
HIDDEN = 32
NUM_HEADS = 4
HEAD_DIM = HIDDEN // NUM_HEADS
INTERMEDIATE = 64
NUM_LAYERS = 2
MAX_POS = 16
N_CLASSES = 3
C_PAD = 128                      # lane-dense padded class dim; sliced to N_CLASSES in wrapper
LN_EPS = 1e-12
ATTN_SCALE = 1.0 / math.sqrt(HEAD_DIM)


# ----------------------------- in-kernel helpers -----------------------------
def _layer_norm(x, g, b):
    mu = jnp.mean(x, axis=-1, keepdims=True)
    var = jnp.mean(jnp.square(x - mu), axis=-1, keepdims=True)
    return (x - mu) * jax.lax.rsqrt(var + LN_EPS) * g + b


def _gelu(x):
    # TODO(synk): BERT uses exact erf-GELU; tanh approximation kept for clean TPU lowering.
    c = math.sqrt(2.0 / math.pi)
    return 0.5 * x * (1.0 + jnp.tanh(c * (x + 0.044715 * x * x * x)))


# --------------------------------- fused kernel ------------------------------
def bert_stack_kernel(x_ref, m_ref, eg_ref, eb_ref,
                      wq_ref, bq_ref, wk_ref, bk_ref, wv_ref, bv_ref,
                      wo_ref, bo_ref, g1_ref, b1_ref,
                      wi_ref, bi_ref, wf_ref, bf_ref, g2_ref, b2_ref,
                      pw_ref, pb_ref, ow_ref, ob_ref,
                      logits_ref, x_sc):
    layer = pl.program_id(1)

    # Layer 0: embedding LayerNorm seeds the residual stream held in VMEM scratch.
    @pl.when(layer == 0)
    def _():
        x_sc[...] = _layer_norm(x_ref[...], eg_ref[...], eb_ref[...])

    x = x_sc[...]                                  # (S, H) f32 residual stream
    x_bf = x.astype(jnp.bfloat16)
    mask_bias = m_ref[...]                         # (1, S) f32 additive key bias (0 / -1e9)

    def dense(t_bf, w_ref, b_ref):                 # 2-D MXU matmul: bf16 operands, f32 acc
        return jnp.dot(t_bf, w_ref[...],
                       preferred_element_type=jnp.float32) + b_ref[...]

    q = dense(x_bf, wq_ref, bq_ref)                # (S, H) f32
    k = dense(x_bf, wk_ref, bk_ref)
    v = dense(x_bf, wv_ref, bv_ref)

    # TODO(synk): heads run as a static unrolled loop of plain 2-D matmuls; the single rank-4
    # 'bqhd,bkhd->bhqk' batched-head einsum does not lower through Mosaic's in-kernel
    # dot_general (multi-batch-dim contraction), so per-head lane slices are kept.
    ctx_heads = []
    for h in range(NUM_HEADS):
        sl = slice(h * HEAD_DIM, (h + 1) * HEAD_DIM)
        qh = q[:, sl].astype(jnp.bfloat16)
        kh = k[:, sl].astype(jnp.bfloat16)
        vh = v[:, sl].astype(jnp.bfloat16)
        s = jnp.einsum('qd,kd->qk', qh, kh,
                       preferred_element_type=jnp.float32) * ATTN_SCALE
        s = s + mask_bias                          # f32 bias after f32 accumulation
        s = s - jnp.max(s, axis=-1, keepdims=True)
        p = jnp.exp(s)
        p = p * pl.reciprocal(jnp.sum(p, axis=-1, keepdims=True), approx=True)
        ctx_heads.append(jnp.dot(p.astype(jnp.bfloat16), vh,
                                 preferred_element_type=jnp.float32))
    ctx = jnp.concatenate(ctx_heads, axis=-1)      # (S, H) f32

    attn_out = dense(ctx.astype(jnp.bfloat16), wo_ref, bo_ref)
    h1 = _layer_norm(attn_out + x, g1_ref[...], b1_ref[...])

    inter = _gelu(dense(h1.astype(jnp.bfloat16), wi_ref, bi_ref))     # (S, I) f32
    ffn = dense(inter.astype(jnp.bfloat16), wf_ref, bf_ref)           # (S, H) f32
    out_tokens = _layer_norm(ffn + h1, g2_ref[...], b2_ref[...])
    x_sc[...] = out_tokens

    # Last layer: fused BERT pooler (tanh Linear on [CLS]) + classifier head.
    @pl.when(layer == pl.num_programs(1) - 1)
    def _():
        cls = out_tokens[0:1, :]                   # (1, H) [CLS] token
        pooled = jnp.tanh(jnp.dot(cls.astype(jnp.bfloat16), pw_ref[...],
                                  preferred_element_type=jnp.float32) + pb_ref[...])
        # TODO(synk): nn.Dropout(p=0.3) is identity in eval mode; training-mode dropout omitted.
        logits_ref[...] = jnp.dot(pooled.astype(jnp.bfloat16), ow_ref[...],
                                  preferred_element_type=jnp.float32) + ob_ref[...]


# ------------------------------- pallas wrapper -------------------------------
def pallas_bert_forward(params, emb, mask_bias):
    B, S, H = emb.shape
    I = INTERMEDIATE

    def resident(shape):      # whole (small) array, constant across grid -> VMEM-resident
        return pl.BlockSpec(shape, lambda b, l, _n=len(shape): (0,) * _n)

    def per_layer(shape):     # stacked (L, ...) -> pick layer l, squeeze leading dim
        return pl.BlockSpec((None,) + shape,
                            lambda b, l, _n=len(shape): (l,) + (0,) * _n)

    def per_batch(shape):     # (B, ...) -> pick batch b, squeeze leading dim
        return pl.BlockSpec((None,) + shape,
                            lambda b, l, _n=len(shape): (b,) + (0,) * _n)

    in_specs = [
        per_batch((S, H)),                           # embeddings
        per_batch((1, S)),                           # attention mask bias
        resident((1, H)), resident((1, H)),          # embedding LayerNorm gamma/beta
        per_layer((H, H)), per_layer((1, H)),        # Wq, bq
        per_layer((H, H)), per_layer((1, H)),        # Wk, bk
        per_layer((H, H)), per_layer((1, H)),        # Wv, bv
        per_layer((H, H)), per_layer((1, H)),        # Wo, bo
        per_layer((1, H)), per_layer((1, H)),        # LN1 gamma/beta
        per_layer((H, I)), per_layer((1, I)),        # W_intermediate, b_intermediate
        per_layer((I, H)), per_layer((1, H)),        # W_ffn_out, b_ffn_out
        per_layer((1, H)), per_layer((1, H)),        # LN2 gamma/beta
        resident((H, H)), resident((1, H)),          # pooler
        resident((H, C_PAD)), resident((1, C_PAD)),  # classifier (lane-dense padded)
    ]
    args = (emb, mask_bias, params['emb_ln_g'], params['emb_ln_b'],
            params['wq'], params['bq'], params['wk'], params['bk'],
            params['wv'], params['bv'], params['wo'], params['bo'],
            params['ln1_g'], params['ln1_b'],
            params['wi'], params['bi'], params['wf'], params['bf'],
            params['ln2_g'], params['ln2_b'],
            params['pooler_w'], params['pooler_b'],
            params['out_w'], params['out_b'])

    logits_padded = pl.pallas_call(
        bert_stack_kernel,
        out_shape=jax.ShapeDtypeStruct((B, 1, C_PAD), jnp.float32),
        grid=(B, NUM_LAYERS),
        in_specs=in_specs,
        out_specs=per_batch((1, C_PAD)),
        scratch_shapes=[pltpu.VMEM((S, H), jnp.float32)],   # per-core residual stream
        compiler_params=pltpu.CompilerParams(
            dimension_semantics=("parallel", "arbitrary"),
            # explicit budget; safe on v7x (64 MiB physical VMEM per core) and v5e/v6e
            vmem_limit_bytes=32 * 1024 * 1024),
    )(*args)
    return logits_padded[:, 0, :N_CLASSES]


# ------------------------------- parameters ----------------------------------
def init_params(key):
    def w(k, shape, std=0.02):
        return std * jax.random.normal(k, shape, jnp.float32)

    keys = jax.random.split(key, 11)
    L, H, I = NUM_LAYERS, HIDDEN, INTERMEDIATE

    def lw(k, shape):            # stacked per-layer matmul weight, stored bf16 for the MXU
        return w(k, (L,) + shape).astype(jnp.bfloat16)

    out_w = jnp.zeros((H, C_PAD), jnp.float32).at[:, :N_CLASSES].set(w(keys[4], (H, N_CLASSES)))

    return {
        'word_emb': w(keys[0], (VOCAB, H)),
        'pos_emb': w(keys[1], (MAX_POS, H)),
        'type_emb': w(keys[2], (2, H)),
        'emb_ln_g': jnp.ones((1, H), jnp.float32),
        'emb_ln_b': jnp.zeros((1, H), jnp.float32),
        # encoder stack: weights stacked over layers; matmul operands stored bf16
        'wq': lw(keys[5], (H, H)), 'bq': jnp.zeros((L, 1, H), jnp.float32),
        'wk': lw(keys[6], (H, H)), 'bk': jnp.zeros((L, 1, H), jnp.float32),
        'wv': lw(keys[7], (H, H)), 'bv': jnp.zeros((L, 1, H), jnp.float32),
        'wo': lw(keys[8], (H, H)), 'bo': jnp.zeros((L, 1, H), jnp.float32),
        'ln1_g': jnp.ones((L, 1, H), jnp.float32),
        'ln1_b': jnp.zeros((L, 1, H), jnp.float32),
        'wi': lw(keys[9], (H, I)), 'bi': jnp.zeros((L, 1, I), jnp.float32),
        'wf': lw(keys[10], (I, H)), 'bf': jnp.zeros((L, 1, H), jnp.float32),
        'ln2_g': jnp.ones((L, 1, H), jnp.float32),
        'ln2_b': jnp.zeros((L, 1, H), jnp.float32),
        # pooler + classifier head (classifier padded to a lane-dense 128-wide output)
        'pooler_w': w(keys[3], (H, H)).astype(jnp.bfloat16),
        'pooler_b': jnp.zeros((1, H), jnp.float32),
        'out_w': out_w.astype(jnp.bfloat16),
        'out_b': jnp.zeros((1, C_PAD), jnp.float32),
    }


# -------------------------------- forward pass --------------------------------
def sentiment_classifier_forward(params, input_ids, attention_mask):
    B, S = input_ids.shape
    # Embedding table gathers stay in plain JAX glue; token_type_ids = 0 everywhere.
    emb = (params['word_emb'][input_ids]
           + params['pos_emb'][:S][None, :, :]
           + params['type_emb'][0][None, None, :]).astype(jnp.float32)
    # Additive attention bias, kept f32 (bf16 would lose / overflow the -1e9 bias).
    mask_bias = ((1.0 - attention_mask.astype(jnp.float32)) * -1e9)[:, None, :]   # (B, 1, S)
    return pallas_bert_forward(params, emb, mask_bias)                            # (B, 3)


# ----------------------------------- main -------------------------------------
if __name__ == "__main__":
    key = jax.random.PRNGKey(0)
    pkey, ikey = jax.random.split(key)

    params = init_params(pkey)

    B, S = 2, 8
    input_ids = jax.random.randint(ikey, (B, S), 0, VOCAB, dtype=jnp.int32)
    attention_mask = jnp.array([[1, 1, 1, 1, 1, 1, 1, 1],
                                [1, 1, 1, 1, 1, 0, 0, 0]], dtype=jnp.int32)

    logits = sentiment_classifier_forward(params, input_ids, attention_mask)
    logits = jax.block_until_ready(logits)

    assert logits.shape == (B, N_CLASSES)
    assert bool(jnp.all(jnp.isfinite(logits)))
    print("KERNEL_OK")
</pallas_src>

<mosaic_0001>
module attributes {stable_mosaic.version = 11 : i64} {
  func.func @bert_stack_kernel(%arg0: i32, %arg1: i32, %arg2: memref<1x8x32xf32, #tpu.memory_space<vmem>>, %arg3: memref<1x1x8xf32, #tpu.memory_space<vmem>>, %arg4: memref<1x32xf32, #tpu.memory_space<vmem>>, %arg5: memref<1x32xf32, #tpu.memory_space<vmem>>, %arg6: memref<1x32x32xbf16, #tpu.memory_space<vmem>>, %arg7: memref<1x1x32xf32, #tpu.memory_space<vmem>>, %arg8: memref<1x32x32xbf16, #tpu.memory_space<vmem>>, %arg9: memref<1x1x32xf32, #tpu.memory_space<vmem>>, %arg10: memref<1x32x32xbf16, #tpu.memory_space<vmem>>, %arg11: memref<1x1x32xf32, #tpu.memory_space<vmem>>, %arg12: memref<1x32x32xbf16, #tpu.memory_space<vmem>>, %arg13: memref<1x1x32xf32, #tpu.memory_space<vmem>>, %arg14: memref<1x1x32xf32, #tpu.memory_space<vmem>>, %arg15: memref<1x1x32xf32, #tpu.memory_space<vmem>>, %arg16: memref<1x32x64xbf16, #tpu.memory_space<vmem>>, %arg17: memref<1x1x64xf32, #tpu.memory_space<vmem>>, %arg18: memref<1x64x32xbf16, #tpu.memory_space<vmem>>, %arg19: memref<1x1x32xf32, #tpu.memory_space<vmem>>, %arg20: memref<1x1x32xf32, #tpu.memory_space<vmem>>, %arg21: memref<1x1x32xf32, #tpu.memory_space<vmem>>, %arg22: memref<32x32xbf16, #tpu.memory_space<vmem>>, %arg23: memref<1x32xf32, #tpu.memory_space<vmem>>, %arg24: memref<32x128xbf16, #tpu.memory_space<vmem>>, %arg25: memref<1x128xf32, #tpu.memory_space<vmem>>, %arg26: memref<1x1x128xf32, #tpu.memory_space<vmem>>, %arg27: memref<8x32xf32, #tpu.memory_space<vmem>>) attributes {dimension_semantics = [#tpu.dimension_semantics<parallel>, #tpu.dimension_semantics<arbitrary>], iteration_bounds = array<i64: 2, 2>, scalar_prefetch = 0 : i64, scratch_operands = 1 : i64, tpu.core_type = #tpu.core_type<tc>, window_params = [{transform_indices = @transform_0, window_bounds = array<i64: 1, 8, 32>}, {transform_indices = @transform_1, window_bounds = array<i64: 1, 1, 8>}, {pipeline_mode = #tpu.pipeline_mode<synchronous>, transform_indices = @transform_2, window_bounds = array<i64: 1, 32>}, {pipeline_mode = #tpu.pipeline_mode<synchronous>, transform_indices = @transform_3, window_bounds = array<i64: 1, 32>}, {transform_indices = @transform_4, window_bounds = array<i64: 1, 32, 32>}, {transform_indices = @transform_5, window_bounds = array<i64: 1, 1, 32>}, {transform_indices = @transform_6, window_bounds = array<i64: 1, 32, 32>}, {transform_indices = @transform_7, window_bounds = array<i64: 1, 1, 32>}, {transform_indices = @transform_8, window_bounds = array<i64: 1, 32, 32>}, {transform_indices = @transform_9, window_bounds = array<i64: 1, 1, 32>}, {transform_indices = @transform_10, window_bounds = array<i64: 1, 32, 32>}, {transform_indices = @transform_11, window_bounds = array<i64: 1, 1, 32>}, {transform_indices = @transform_12, window_bounds = array<i64: 1, 1, 32>}, {transform_indices = @transform_13, window_bounds = array<i64: 1, 1, 32>}, {transform_indices = @transform_14, window_bounds = array<i64: 1, 32, 64>}, {transform_indices = @transform_15, window_bounds = array<i64: 1, 1, 64>}, {transform_indices = @transform_16, window_bounds = array<i64: 1, 64, 32>}, {transform_indices = @transform_17, window_bounds = array<i64: 1, 1, 32>}, {transform_indices = @transform_18, window_bounds = array<i64: 1, 1, 32>}, {transform_indices = @transform_19, window_bounds = array<i64: 1, 1, 32>}, {pipeline_mode = #tpu.pipeline_mode<synchronous>, transform_indices = @transform_20, window_bounds = array<i64: 32, 32>}, {pipeline_mode = #tpu.pipeline_mode<synchronous>, transform_indices = @transform_21, window_bounds = array<i64: 1, 32>}, {pipeline_mode = #tpu.pipeline_mode<synchronous>, transform_indices = @transform_22, window_bounds = array<i64: 32, 128>}, {pipeline_mode = #tpu.pipeline_mode<synchronous>, transform_indices = @transform_23, window_bounds = array<i64: 1, 128>}, {transform_indices = @transform_24, window_bounds = array<i64: 1, 1, 128>}]} {
    %c0_i32 = arith.constant 0 : i32
    %0 = arith.cmpi eq, %arg1, %c0_i32 : i32
    %1 = arith.extui %0 : i1 to i32
    %c0_i32_0 = arith.constant 0 : i32
    %2 = arith.cmpi ne, %1, %c0_i32_0 : i32
    scf.if %2 {
      %c0_95 = arith.constant 0 : index
      %c0_96 = arith.constant 0 : index
      %c0_97 = arith.constant 0 : index
      %216 = vector.load %arg2[%c0_95, %c0_96, %c0_97] : memref<1x8x32xf32, #tpu.memory_space<vmem>>, vector<1x8x32xf32>
      %217 = vector.shape_cast %216 : vector<1x8x32xf32> to vector<8x32xf32>
      %c0_98 = arith.constant 0 : index
      %c0_99 = arith.constant 0 : index
      %218 = vector.load %arg4[%c0_98, %c0_99] : memref<1x32xf32, #tpu.memory_space<vmem>>, vector<1x32xf32>
      %c0_100 = arith.constant 0 : index
      %c0_101 = arith.constant 0 : index
      %219 = vector.load %arg5[%c0_100, %c0_101] : memref<1x32xf32, #tpu.memory_space<vmem>>, vector<1x32xf32>
      %cst_102 = arith.constant dense<0.000000e+00> : vector<8xf32>
      %220 = vector.multi_reduction <add>, %217, %cst_102 [1] : vector<8x32xf32> to vector<8xf32>
      %221 = vector.shape_cast %220 : vector<8xf32> to vector<8x1xf32>
      %cst_103 = arith.constant 3.200000e+01 : f32
      %222 = vector.broadcast %cst_103 : f32 to vector<8x1xf32>
      %223 = arith.divf %221, %222 : vector<8x1xf32>
      %224 = vector.broadcast %223 : vector<8x1xf32> to vector<8x32xf32>
      %225 = arith.subf %217, %224 : vector<8x32xf32>
      %226 = arith.mulf %225, %225 : vector<8x32xf32>
      %cst_104 = arith.constant dense<0.000000e+00> : vector<8xf32>
      %227 = vector.multi_reduction <add>, %226, %cst_104 [1] : vector<8x32xf32> to vector<8xf32>
      %228 = vector.shape_cast %227 : vector<8xf32> to vector<8x1xf32>
      %cst_105 = arith.constant 3.200000e+01 : f32
      %229 = vector.broadcast %cst_105 : f32 to vector<8x1xf32>
      %230 = arith.divf %228, %229 : vector<8x1xf32>
      %231 = vector.broadcast %223 : vector<8x1xf32> to vector<8x32xf32>
      %232 = arith.subf %217, %231 : vector<8x32xf32>
      %cst_106 = arith.constant 9.99999996E-13 : f32
      %233 = vector.broadcast %cst_106 : f32 to vector<8x1xf32>
      %234 = arith.addf %230, %233 : vector<8x1xf32>
      %235 = math.rsqrt %234 : vector<8x1xf32>
      %236 = vector.broadcast %235 : vector<8x1xf32> to vector<8x32xf32>
      %237 = arith.mulf %232, %236 : vector<8x32xf32>
      %238 = vector.broadcast %218 : vector<1x32xf32> to vector<8x32xf32>
      %239 = arith.mulf %237, %238 : vector<8x32xf32>
      %240 = vector.broadcast %219 : vector<1x32xf32> to vector<8x32xf32>
      %241 = arith.addf %239, %240 : vector<8x32xf32>
      %c0_107 = arith.constant 0 : index
      %c0_108 = arith.constant 0 : index
      %242 = vector.load %arg27[%c0_107, %c0_108] : memref<8x32xf32, #tpu.memory_space<vmem>>, vector<8x32xf32>
      tpu.vector_store %arg27[%c0_107, %c0_108], %241 {strides = array<i32>} : memref<8x32xf32, #tpu.memory_space<vmem>>, vector<8x32xf32>,
    } else {
    }
    %c0 = arith.constant 0 : index
    %c0_1 = arith.constant 0 : index
    %3 = vector.load %arg27[%c0, %c0_1] : memref<8x32xf32, #tpu.memory_space<vmem>>, vector<8x32xf32>
    %4 = arith.truncf %3 : vector<8x32xf32> to vector<8x32xbf16>
    %c0_2 = arith.constant 0 : index
    %c0_3 = arith.constant 0 : index
    %c0_4 = arith.constant 0 : index
    %5 = vector.load %arg3[%c0_2, %c0_3, %c0_4] : memref<1x1x8xf32, #tpu.memory_space<vmem>>, vector<1x1x8xf32>
    %6 = vector.shape_cast %5 : vector<1x1x8xf32> to vector<1x8xf32>
    %c0_5 = arith.constant 0 : index
    %c0_6 = arith.constant 0 : index
    %c0_7 = arith.constant 0 : index
    %7 = vector.load %arg6[%c0_5, %c0_6, %c0_7] : memref<1x32x32xbf16, #tpu.memory_space<vmem>>, vector<1x32x32xbf16>
    %8 = vector.shape_cast %7 : vector<1x32x32xbf16> to vector<32x32xbf16>
    %cst = arith.constant dense<0.000000e+00> : vector<8x32xf32>
    %9 = tpu.matmul %4, %8, %cst {dimension_numbers = #tpu.dot_dimension_numbers<[1], [0], [0], [1], [0, 0, 1, 1], [], []>} : vector<8x32xbf16>, vector<32x32xbf16>, vector<8x32xf32> -> vector<8x32xf32>
    %c0_8 = arith.constant 0 : index
    %c0_9 = arith.constant 0 : index
    %c0_10 = arith.constant 0 : index
    %10 = vector.load %arg7[%c0_8, %c0_9, %c0_10] : memref<1x1x32xf32, #tpu.memory_space<vmem>>, vector<1x1x32xf32>
    %11 = vector.shape_cast %10 : vector<1x1x32xf32> to vector<1x32xf32>
    %12 = vector.broadcast %11 : vector<1x32xf32> to vector<8x32xf32>
    %13 = arith.addf %9, %12 : vector<8x32xf32>
    %c0_11 = arith.constant 0 : index
    %c0_12 = arith.constant 0 : index
    %c0_13 = arith.constant 0 : index
    %14 = vector.load %arg8[%c0_11, %c0_12, %c0_13] : memref<1x32x32xbf16, #tpu.memory_space<vmem>>, vector<1x32x32xbf16>
    %15 = vector.shape_cast %14 : vector<1x32x32xbf16> to vector<32x32xbf16>
    %cst_14 = arith.constant dense<0.000000e+00> : vector<8x32xf32>
    %16 = tpu.matmul %4, %15, %cst_14 {dimension_numbers = #tpu.dot_dimension_numbers<[1], [0], [0], [1], [0, 0, 1, 1], [], []>} : vector<8x32xbf16>, vector<32x32xbf16>, vector<8x32xf32> -> vector<8x32xf32>
    %c0_15 = arith.constant 0 : index
    %c0_16 = arith.constant 0 : index
    %c0_17 = arith.constant 0 : index
    %17 = vector.load %arg9[%c0_15, %c0_16, %c0_17] : memref<1x1x32xf32, #tpu.memory_space<vmem>>, vector<1x1x32xf32>
    %18 = vector.shape_cast %17 : vector<1x1x32xf32> to vector<1x32xf32>
    %19 = vector.broadcast %18 : vector<1x32xf32> to vector<8x32xf32>
    %20 = arith.addf %16, %19 : vector<8x32xf32>
    %c0_18 = arith.constant 0 : index
    %c0_19 = arith.constant 0 : index
    %c0_20 = arith.constant 0 : index
    %21 = vector.load %arg10[%c0_18, %c0_19, %c0_20] : memref<1x32x32xbf16, #tpu.memory_space<vmem>>, vector<1x32x32xbf16>
    %22 = vector.shape_cast %21 : vector<1x32x32xbf16> to vector<32x32xbf16>
    %cst_21 = arith.constant dense<0.000000e+00> : vector<8x32xf32>
    %23 = tpu.matmul %4, %22, %cst_21 {dimension_numbers = #tpu.dot_dimension_numbers<[1], [0], [0], [1], [0, 0, 1, 1], [], []>} : vector<8x32xbf16>, vector<32x32xbf16>, vector<8x32xf32> -> vector<8x32xf32>
    %c0_22 = arith.constant 0 : index
    %c0_23 = arith.constant 0 : index
    %c0_24 = arith.constant 0 : index
    %24 = vector.load %arg11[%c0_22, %c0_23, %c0_24] : memref<1x1x32xf32, #tpu.memory_space<vmem>>, vector<1x1x32xf32>
    %25 = vector.shape_cast %24 : vector<1x1x32xf32> to vector<1x32xf32>
    %26 = vector.broadcast %25 : vector<1x32xf32> to vector<8x32xf32>
    %27 = arith.addf %23, %26 : vector<8x32xf32>
    %28 = vector.extract_strided_slice %13 {offsets = [0, 0], sizes = [8, 8], strides = [1, 1]} : vector<8x32xf32> to vector<8x8xf32>
    %29 = arith.truncf %28 : vector<8x8xf32> to vector<8x8xbf16>
    %30 = vector.extract_strided_slice %20 {offsets = [0, 0], sizes = [8, 8], strides = [1, 1]} : vector<8x32xf32> to vector<8x8xf32>
    %31 = arith.truncf %30 : vector<8x8xf32> to vector<8x8xbf16>
    %32 = vector.extract_strided_slice %27 {offsets = [0, 0], sizes = [8, 8], strides = [1, 1]} : vector<8x32xf32> to vector<8x8xf32>
    %33 = arith.truncf %32 : vector<8x8xf32> to vector<8x8xbf16>
    "tpu.trace_start"() <{level = 10 : i32, message = "qd,kd->qk"}> : () -> ()
    %cst_25 = arith.constant dense<0.000000e+00> : vector<8x8xf32>
    %34 = tpu.matmul %29, %31, %cst_25 {dimension_numbers = #tpu.dot_dimension_numbers<[1], [1], [0], [0], [0, 0, 1, 0], [], []>} : vector<8x8xbf16>, vector<8x8xbf16>, vector<8x8xf32> -> vector<8x8xf32>
    "tpu.trace_stop"() : () -> ()
    %cst_26 = arith.constant 0.353553385 : f32
    %35 = vector.broadcast %cst_26 : f32 to vector<8x8xf32>
    %36 = arith.mulf %34, %35 : vector<8x8xf32>
    %37 = vector.broadcast %6 : vector<1x8xf32> to vector<8x8xf32>
    %38 = arith.addf %36, %37 : vector<8x8xf32>
    %cst_27 = arith.constant dense<0xFF800000> : vector<8xf32>
    %39 = vector.multi_reduction <maximumf>, %38, %cst_27 [1] : vector<8x8xf32> to vector<8xf32>
    %40 = vector.shape_cast %39 : vector<8xf32> to vector<8x1xf32>
    %41 = vector.broadcast %40 : vector<8x1xf32> to vector<8x8xf32>
    %42 = arith.subf %38, %41 : vector<8x8xf32>
    %43 = math.exp %42 : vector<8x8xf32>
    %cst_28 = arith.constant dense<0.000000e+00> : vector<8xf32>
    %44 = vector.multi_reduction <add>, %43, %cst_28 [1] : vector<8x8xf32> to vector<8xf32>
    %45 = vector.shape_cast %44 : vector<8xf32> to vector<8x1xf32>
    %46 = tpu.reciprocal %45 {approx = true} : vector<8x1xf32> -> vector<8x1xf32>
    %47 = vector.broadcast %46 : vector<8x1xf32> to vector<8x8xf32>
    %48 = arith.mulf %43, %47 : vector<8x8xf32>
    %49 = arith.truncf %48 : vector<8x8xf32> to vector<8x8xbf16>
    %cst_29 = arith.constant dense<0.000000e+00> : vector<8x8xf32>
    %50 = tpu.matmul %49, %33, %cst_29 {dimension_numbers = #tpu.dot_dimension_numbers<[1], [0], [0], [1], [0, 0, 1, 1], [], []>} : vector<8x8xbf16>, vector<8x8xbf16>, vector<8x8xf32> -> vector<8x8xf32>
    %51 = vector.extract_strided_slice %13 {offsets = [0, 8], sizes = [8, 8], strides = [1, 1]} : vector<8x32xf32> to vector<8x8xf32>
    %52 = arith.truncf %51 : vector<8x8xf32> to vector<8x8xbf16>
    %53 = vector.extract_strided_slice %20 {offsets = [0, 8], sizes = [8, 8], strides = [1, 1]} : vector<8x32xf32> to vector<8x8xf32>
    %54 = arith.truncf %53 : vector<8x8xf32> to vector<8x8xbf16>
    %55 = vector.extract_strided_slice %27 {offsets = [0, 8], sizes = [8, 8], strides = [1, 1]} : vector<8x32xf32> to vector<8x8xf32>
    %56 = arith.truncf %55 : vector<8x8xf32> to vector<8x8xbf16>
    "tpu.trace_start"() <{level = 10 : i32, message = "qd,kd->qk"}> : () -> ()
    %cst_30 = arith.constant dense<0.000000e+00> : vector<8x8xf32>
    %57 = tpu.matmul %52, %54, %cst_30 {dimension_numbers = #tpu.dot_dimension_numbers<[1], [1], [0], [0], [0, 0, 1, 0], [], []>} : vector<8x8xbf16>, vector<8x8xbf16>, vector<8x8xf32> -> vector<8x8xf32>
    "tpu.trace_stop"() : () -> ()
    %cst_31 = arith.constant 0.353553385 : f32
    %58 = vector.broadcast %cst_31 : f32 to vector<8x8xf32>
    %59 = arith.mulf %57, %58 : vector<8x8xf32>
    %60 = vector.broadcast %6 : vector<1x8xf32> to vector<8x8xf32>
    %61 = arith.addf %59, %60 : vector<8x8xf32>
    %cst_32 = arith.constant dense<0xFF800000> : vector<8xf32>
    %62 = vector.multi_reduction <maximumf>, %61, %cst_32 [1] : vector<8x8xf32> to vector<8xf32>
    %63 = vector.shape_cast %62 : vector<8xf32> to vector<8x1xf32>
    %64 = vector.broadcast %63 : vector<8x1xf32> to vector<8x8xf32>
    %65 = arith.subf %61, %64 : vector<8x8xf32>
    %66 = math.exp %65 : vector<8x8xf32>
    %cst_33 = arith.constant dense<0.000000e+00> : vector<8xf32>
    %67 = vector.multi_reduction <add>, %66, %cst_33 [1] : vector<8x8xf32> to vector<8xf32>
    %68 = vector.shape_cast %67 : vector<8xf32> to vector<8x1xf32>
    %69 = tpu.reciprocal %68 {approx = true} : vector<8x1xf32> -> vector<8x1xf32>
    %70 = vector.broadcast %69 : vector<8x1xf32> to vector<8x8xf32>
    %71 = arith.mulf %66, %70 : vector<8x8xf32>
    %72 = arith.truncf %71 : vector<8x8xf32> to vector<8x8xbf16>
    %cst_34 = arith.constant dense<0.000000e+00> : vector<8x8xf32>
    %73 = tpu.matmul %72, %56, %cst_34 {dimension_numbers = #tpu.dot_dimension_numbers<[1], [0], [0], [1], [0, 0, 1, 1], [], []>} : vector<8x8xbf16>, vector<8x8xbf16>, vector<8x8xf32> -> vector<8x8xf32>
    %74 = vector.extract_strided_slice %13 {offsets = [0, 16], sizes = [8, 8], strides = [1, 1]} : vector<8x32xf32> to vector<8x8xf32>
    %75 = arith.truncf %74 : vector<8x8xf32> to vector<8x8xbf16>
    %76 = vector.extract_strided_slice %20 {offsets = [0, 16], sizes = [8, 8], strides = [1, 1]} : vector<8x32xf32> to vector<8x8xf32>
    %77 = arith.truncf %76 : vector<8x8xf32> to vector<8x8xbf16>
    %78 = vector.extract_strided_slice %27 {offsets = [0, 16], sizes = [8, 8], strides = [1, 1]} : vector<8x32xf32> to vector<8x8xf32>
    %79 = arith.truncf %78 : vector<8x8xf32> to vector<8x8xbf16>
    "tpu.trace_start"() <{level = 10 : i32, message = "qd,kd->qk"}> : () -> ()
    %cst_35 = arith.constant dense<0.000000e+00> : vector<8x8xf32>
    %80 = tpu.matmul %75, %77, %cst_35 {dimension_numbers = #tpu.dot_dimension_numbers<[1], [1], [0], [0], [0, 0, 1, 0], [], []>} : vector<8x8xbf16>, vector<8x8xbf16>, vector<8x8xf32> -> vector<8x8xf32>
    "tpu.trace_stop"() : () -> ()
    %cst_36 = arith.constant 0.353553385 : f32
    %81 = vector.broadcast %cst_36 : f32 to vector<8x8xf32>
    %82 = arith.mulf %80, %81 : vector<8x8xf32>
    %83 = vector.broadcast %6 : vector<1x8xf32> to vector<8x8xf32>
    %84 = arith.addf %82, %83 : vector<8x8xf32>
    %cst_37 = arith.constant dense<0xFF800000> : vector<8xf32>
    %85 = vector.multi_reduction <maximumf>, %84, %cst_37 [1] : vector<8x8xf32> to vector<8xf32>
    %86 = vector.shape_cast %85 : vector<8xf32> to vector<8x1xf32>
    %87 = vector.broadcast %86 : vector<8x1xf32> to vector<8x8xf32>
    %88 = arith.subf %84, %87 : vector<8x8xf32>
    %89 = math.exp %88 : vector<8x8xf32>
    %cst_38 = arith.constant dense<0.000000e+00> : vector<8xf32>
    %90 = vector.multi_reduction <add>, %89, %cst_38 [1] : vector<8x8xf32> to vector<8xf32>
    %91 = vector.shape_cast %90 : vector<8xf32> to vector<8x1xf32>
    %92 = tpu.reciprocal %91 {approx = true} : vector<8x1xf32> -> vector<8x1xf32>
    %93 = vector.broadcast %92 : vector<8x1xf32> to vector<8x8xf32>
    %94 = arith.mulf %89, %93 : vector<8x8xf32>
    %95 = arith.truncf %94 : vector<8x8xf32> to vector<8x8xbf16>
    %cst_39 = arith.constant dense<0.000000e+00> : vector<8x8xf32>
    %96 = tpu.matmul %95, %79, %cst_39 {dimension_numbers = #tpu.dot_dimension_numbers<[1], [0], [0], [1], [0, 0, 1, 1], [], []>} : vector<8x8xbf16>, vector<8x8xbf16>, vector<8x8xf32> -> vector<8x8xf32>
    %97 = vector.extract_strided_slice %13 {offsets = [0, 24], sizes = [8, 8], strides = [1, 1]} : vector<8x32xf32> to vector<8x8xf32>
    %98 = arith.truncf %97 : vector<8x8xf32> to vector<8x8xbf16>
    %99 = vector.extract_strided_slice %20 {offsets = [0, 24], sizes = [8, 8], strides = [1, 1]} : vector<8x32xf32> to vector<8x8xf32>
    %100 = arith.truncf %99 : vector<8x8xf32> to vector<8x8xbf16>
    %101 = vector.extract_strided_slice %27 {offsets = [0, 24], sizes = [8, 8], strides = [1, 1]} : vector<8x32xf32> to vector<8x8xf32>
    %102 = arith.truncf %101 : vector<8x8xf32> to vector<8x8xbf16>
    "tpu.trace_start"() <{level = 10 : i32, message = "qd,kd->qk"}> : () -> ()
    %cst_40 = arith.constant dense<0.000000e+00> : vector<8x8xf32>
    %103 = tpu.matmul %98, %100, %cst_40 {dimension_numbers = #tpu.dot_dimension_numbers<[1], [1], [0], [0], [0, 0, 1, 0], [], []>} : vector<8x8xbf16>, vector<8x8xbf16>, vector<8x8xf32> -> vector<8x8xf32>
    "tpu.trace_stop"() : () -> ()
    %cst_41 = arith.constant 0.353553385 : f32
    %104 = vector.broadcast %cst_41 : f32 to vector<8x8xf32>
    %105 = arith.mulf %103, %104 : vector<8x8xf32>
    %106 = vector.broadcast %6 : vector<1x8xf32> to vector<8x8xf32>
    %107 = arith.addf %105, %106 : vector<8x8xf32>
    %cst_42 = arith.constant dense<0xFF800000> : vector<8xf32>
    %108 = vector.multi_reduction <maximumf>, %107, %cst_42 [1] : vector<8x8xf32> to vector<8xf32>
    %109 = vector.shape_cast %108 : vector<8xf32> to vector<8x1xf32>
    %110 = vector.broadcast %109 : vector<8x1xf32> to vector<8x8xf32>
    %111 = arith.subf %107, %110 : vector<8x8xf32>
    %112 = math.exp %111 : vector<8x8xf32>
    %cst_43 = arith.constant dense<0.000000e+00> : vector<8xf32>
    %113 = vector.multi_reduction <add>, %112, %cst_43 [1] : vector<8x8xf32> to vector<8xf32>
    %114 = vector.shape_cast %113 : vector<8xf32> to vector<8x1xf32>
    %115 = tpu.reciprocal %114 {approx = true} : vector<8x1xf32> -> vector<8x1xf32>
    %116 = vector.broadcast %115 : vector<8x1xf32> to vector<8x8xf32>
    %117 = arith.mulf %112, %116 : vector<8x8xf32>
    %118 = arith.truncf %117 : vector<8x8xf32> to vector<8x8xbf16>
    %cst_44 = arith.constant dense<0.000000e+00> : vector<8x8xf32>
    %119 = tpu.matmul %118, %102, %cst_44 {dimension_numbers = #tpu.dot_dimension_numbers<[1], [0], [0], [1], [0, 0, 1, 1], [], []>} : vector<8x8xbf16>, vector<8x8xbf16>, vector<8x8xf32> -> vector<8x8xf32>
    %120 = tpu.concatenate %50, %73, %96, %119 in 1 : vector<8x8xf32>, vector<8x8xf32>, vector<8x8xf32>, vector<8x8xf32> -> vector<8x32xf32>
    %121 = arith.truncf %120 : vector<8x32xf32> to vector<8x32xbf16>
    %c0_45 = arith.constant 0 : index
    %c0_46 = arith.constant 0 : index
    %c0_47 = arith.constant 0 : index
    %122 = vector.load %arg12[%c0_45, %c0_46, %c0_47] : memref<1x32x32xbf16, #tpu.memory_space<vmem>>, vector<1x32x32xbf16>
    %123 = vector.shape_cast %122 : vector<1x32x32xbf16> to vector<32x32xbf16>
    %cst_48 = arith.constant dense<0.000000e+00> : vector<8x32xf32>
    %124 = tpu.matmul %121, %123, %cst_48 {dimension_numbers = #tpu.dot_dimension_numbers<[1], [0], [0], [1], [0, 0, 1, 1], [], []>} : vector<8x32xbf16>, vector<32x32xbf16>, vector<8x32xf32> -> vector<8x32xf32>
    %c0_49 = arith.constant 0 : index
    %c0_50 = arith.constant 0 : index
    %c0_51 = arith.constant 0 : index
    %125 = vector.load %arg13[%c0_49, %c0_50, %c0_51] : memref<1x1x32xf32, #tpu.memory_space<vmem>>, vector<1x1x32xf32>
    %126 = vector.shape_cast %125 : vector<1x1x32xf32> to vector<1x32xf32>
    %127 = vector.broadcast %126 : vector<1x32xf32> to vector<8x32xf32>
    %128 = arith.addf %124, %127 : vector<8x32xf32>
    %129 = arith.addf %128, %3 : vector<8x32xf32>
    %c0_52 = arith.constant 0 : index
    %c0_53 = arith.constant 0 : index
    %c0_54 = arith.constant 0 : index
    %130 = vector.load %arg14[%c0_52, %c0_53, %c0_54] : memref<1x1x32xf32, #tpu.memory_space<vmem>>, vector<1x1x32xf32>
    %131 = vector.shape_cast %130 : vector<1x1x32xf32> to vector<1x32xf32>
    %c0_55 = arith.constant 0 : index
    %c0_56 = arith.constant 0 : index
    %c0_57 = arith.constant 0 : index
    %132 = vector.load %arg15[%c0_55, %c0_56, %c0_57] : memref<1x1x32xf32, #tpu.memory_space<vmem>>, vector<1x1x32xf32>
    %133 = vector.shape_cast %132 : vector<1x1x32xf32> to vector<1x32xf32>
    %cst_58 = arith.constant dense<0.000000e+00> : vector<8xf32>
    %134 = vector.multi_reduction <add>, %129, %cst_58 [1] : vector<8x32xf32> to vector<8xf32>
    %135 = vector.shape_cast %134 : vector<8xf32> to vector<8x1xf32>
    %cst_59 = arith.constant 3.200000e+01 : f32
    %136 = vector.broadcast %cst_59 : f32 to vector<8x1xf32>
    %137 = arith.divf %135, %136 : vector<8x1xf32>
    %138 = vector.broadcast %137 : vector<8x1xf32> to vector<8x32xf32>
    %139 = arith.subf %129, %138 : vector<8x32xf32>
    %140 = arith.mulf %139, %139 : vector<8x32xf32>
    %cst_60 = arith.constant dense<0.000000e+00> : vector<8xf32>
    %141 = vector.multi_reduction <add>, %140, %cst_60 [1] : vector<8x32xf32> to vector<8xf32>
    %142 = vector.shape_cast %141 : vector<8xf32> to vector<8x1xf32>
    %cst_61 = arith.constant 3.200000e+01 : f32
    %143 = vector.broadcast %cst_61 : f32 to vector<8x1xf32>
    %144 = arith.divf %142, %143 : vector<8x1xf32>
    %145 = vector.broadcast %137 : vector<8x1xf32> to vector<8x32xf32>
    %146 = arith.subf %129, %145 : vector<8x32xf32>
    %cst_62 = arith.constant 9.99999996E-13 : f32
    %147 = vector.broadcast %cst_62 : f32 to vector<8x1xf32>
    %148 = arith.addf %144, %147 : vector<8x1xf32>
    %149 = math.rsqrt %148 : vector<8x1xf32>
    %150 = vector.broadcast %149 : vector<8x1xf32> to vector<8x32xf32>
    %151 = arith.mulf %146, %150 : vector<8x32xf32>
    %152 = vector.broadcast %131 : vector<1x32xf32> to vector<8x32xf32>
    %153 = arith.mulf %151, %152 : vector<8x32xf32>
    %154 = vector.broadcast %133 : vector<1x32xf32> to vector<8x32xf32>
    %155 = arith.addf %153, %154 : vector<8x32xf32>
    %156 = arith.truncf %155 : vector<8x32xf32> to vector<8x32xbf16>
    %c0_63 = arith.constant 0 : index
    %c0_64 = arith.constant 0 : index
    %c0_65 = arith.constant 0 : index
    %157 = vector.load %arg16[%c0_63, %c0_64, %c0_65] : memref<1x32x64xbf16, #tpu.memory_space<vmem>>, vector<1x32x64xbf16>
    %158 = vector.shape_cast %157 : vector<1x32x64xbf16> to vector<32x64xbf16>
    %cst_66 = arith.constant dense<0.000000e+00> : vector<8x64xf32>
    %159 = tpu.matmul %156, %158, %cst_66 {dimension_numbers = #tpu.dot_dimension_numbers<[1], [0], [0], [1], [0, 0, 1, 1], [], []>} : vector<8x32xbf16>, vector<32x64xbf16>, vector<8x64xf32> -> vector<8x64xf32>
    %c0_67 = arith.constant 0 : index
    %c0_68 = arith.constant 0 : index
    %c0_69 = arith.constant 0 : index
    %160 = vector.load %arg17[%c0_67, %c0_68, %c0_69] : memref<1x1x64xf32, #tpu.memory_space<vmem>>, vector<1x1x64xf32>
    %161 = vector.shape_cast %160 : vector<1x1x64xf32> to vector<1x64xf32>
    %162 = vector.broadcast %161 : vector<1x64xf32> to vector<8x64xf32>
    %163 = arith.addf %159, %162 : vector<8x64xf32>
    %cst_70 = arith.constant 5.000000e-01 : f32
    %164 = vector.broadcast %cst_70 : f32 to vector<8x64xf32>
    %165 = arith.mulf %164, %163 : vector<8x64xf32>
    %cst_71 = arith.constant 4.471500e-02 : f32
    %166 = vector.broadcast %cst_71 : f32 to vector<8x64xf32>
    %167 = arith.mulf %166, %163 : vector<8x64xf32>
    %168 = arith.mulf %167, %163 : vector<8x64xf32>
    %169 = arith.mulf %168, %163 : vector<8x64xf32>
    %170 = arith.addf %163, %169 : vector<8x64xf32>
    %cst_72 = arith.constant 0.797884583 : f32
    %171 = vector.broadcast %cst_72 : f32 to vector<8x64xf32>
    %172 = arith.mulf %171, %170 : vector<8x64xf32>
    %173 = math.tanh %172 : vector<8x64xf32>
    %cst_73 = arith.constant 1.000000e+00 : f32
    %174 = vector.broadcast %cst_73 : f32 to vector<8x64xf32>
    %175 = arith.addf %174, %173 : vector<8x64xf32>
    %176 = arith.mulf %165, %175 : vector<8x64xf32>
    %177 = arith.truncf %176 : vector<8x64xf32> to vector<8x64xbf16>
    %c0_74 = arith.constant 0 : index
    %c0_75 = arith.constant 0 : index
    %c0_76 = arith.constant 0 : index
    %178 = vector.load %arg18[%c0_74, %c0_75, %c0_76] : memref<1x64x32xbf16, #tpu.memory_space<vmem>>, vector<1x64x32xbf16>
    %179 = vector.shape_cast %178 : vector<1x64x32xbf16> to vector<64x32xbf16>
    %cst_77 = arith.constant dense<0.000000e+00> : vector<8x32xf32>
    %180 = tpu.matmul %177, %179, %cst_77 {dimension_numbers = #tpu.dot_dimension_numbers<[1], [0], [0], [1], [0, 0, 1, 1], [], []>} : vector<8x64xbf16>, vector<64x32xbf16>, vector<8x32xf32> -> vector<8x32xf32>
    %c0_78 = arith.constant 0 : index
    %c0_79 = arith.constant 0 : index
    %c0_80 = arith.constant 0 : index
    %181 = vector.load %arg19[%c0_78, %c0_79, %c0_80] : memref<1x1x32xf32, #tpu.memory_space<vmem>>, vector<1x1x32xf32>
    %182 = vector.shape_cast %181 : vector<1x1x32xf32> to vector<1x32xf32>
    %183 = vector.broadcast %182 : vector<1x32xf32> to vector<8x32xf32>
    %184 = arith.addf %180, %183 : vector<8x32xf32>
    %185 = arith.addf %184, %155 : vector<8x32xf32>
    %c0_81 = arith.constant 0 : index
    %c0_82 = arith.constant 0 : index
    %c0_83 = arith.constant 0 : index
    %186 = vector.load %arg20[%c0_81, %c0_82, %c0_83] : memref<1x1x32xf32, #tpu.memory_space<vmem>>, vector<1x1x32xf32>
    %187 = vector.shape_cast %186 : vector<1x1x32xf32> to vector<1x32xf32>
    %c0_84 = arith.constant 0 : index
    %c0_85 = arith.constant 0 : index
    %c0_86 = arith.constant 0 : index
    %188 = vector.load %arg21[%c0_84, %c0_85, %c0_86] : memref<1x1x32xf32, #tpu.memory_space<vmem>>, vector<1x1x32xf32>
    %189 = vector.shape_cast %188 : vector<1x1x32xf32> to vector<1x32xf32>
    %cst_87 = arith.constant dense<0.000000e+00> : vector<8xf32>
    %190 = vector.multi_reduction <add>, %185, %cst_87 [1] : vector<8x32xf32> to vector<8xf32>
    %191 = vector.shape_cast %190 : vector<8xf32> to vector<8x1xf32>
    %cst_88 = arith.constant 3.200000e+01 : f32
    %192 = vector.broadcast %cst_88 : f32 to vector<8x1xf32>
    %193 = arith.divf %191, %192 : vector<8x1xf32>
    %194 = vector.broadcast %193 : vector<8x1xf32> to vector<8x32xf32>
    %195 = arith.subf %185, %194 : vector<8x32xf32>
    %196 = arith.mulf %195, %195 : vector<8x32xf32>
    %cst_89 = arith.constant dense<0.000000e+00> : vector<8xf32>
    %197 = vector.multi_reduction <add>, %196, %cst_89 [1] : vector<8x32xf32> to vector<8xf32>
    %198 = vector.shape_cast %197 : vector<8xf32> to vector<8x1xf32>
    %cst_90 = arith.constant 3.200000e+01 : f32
    %199 = vector.broadcast %cst_90 : f32 to vector<8x1xf32>
    %200 = arith.divf %198, %199 : vector<8x1xf32>
    %201 = vector.broadcast %193 : vector<8x1xf32> to vector<8x32xf32>
    %202 = arith.subf %185, %201 : vector<8x32xf32>
    %cst_91 = arith.constant 9.99999996E-13 : f32
    %203 = vector.broadcast %cst_91 : f32 to vector<8x1xf32>
    %204 = arith.addf %200, %203 : vector<8x1xf32>
    %205 = math.rsqrt %204 : vector<8x1xf32>
    %206 = vector.broadcast %205 : vector<8x1xf32> to vector<8x32xf32>
    %207 = arith.mulf %202, %206 : vector<8x32xf32>
    %208 = vector.broadcast %187 : vector<1x32xf32> to vector<8x32xf32>
    %209 = arith.mulf %207, %208 : vector<8x32xf32>
    %210 = vector.broadcast %189 : vector<1x32xf32> to vector<8x32xf32>
    %211 = arith.addf %209, %210 : vector<8x32xf32>
    %c0_92 = arith.constant 0 : index
    %c0_93 = arith.constant 0 : index
    %212 = vector.load %arg27[%c0_92, %c0_93] : memref<8x32xf32, #tpu.memory_space<vmem>>, vector<8x32xf32>
    tpu.vector_store %arg27[%c0_92, %c0_93], %211 {strides = array<i32>} : memref<8x32xf32, #tpu.memory_space<vmem>>, vector<8x32xf32>,
    %c1_i32 = arith.constant 1 : i32
    %213 = arith.cmpi eq, %arg1, %c1_i32 : i32
    %214 = arith.extui %213 : i1 to i32
    %c0_i32_94 = arith.constant 0 : i32
    %215 = arith.cmpi ne, %214, %c0_i32_94 : i32
    scf.if %215 {
      %216 = vector.extract_strided_slice %211 {offsets = [0, 0], sizes = [1, 32], strides = [1, 1]} : vector<8x32xf32> to vector<1x32xf32>
      %217 = arith.truncf %216 : vector<1x32xf32> to vector<1x32xbf16>
      %c0_95 = arith.constant 0 : index
      %c0_96 = arith.constant 0 : index
      %218 = vector.load %arg22[%c0_95, %c0_96] : memref<32x32xbf16, #tpu.memory_space<vmem>>, vector<32x32xbf16>
      %cst_97 = arith.constant dense<0.000000e+00> : vector<1x32xf32>
      %219 = tpu.matmul %217, %218, %cst_97 {dimension_numbers = #tpu.dot_dimension_numbers<[1], [0], [0], [1], [0, 0, 1, 1], [], []>} : vector<1x32xbf16>, vector<32x32xbf16>, vector<1x32xf32> -> vector<1x32xf32>
      %c0_98 = arith.constant 0 : index
      %c0_99 = arith.constant 0 : index
      %220 = vector.load %arg23[%c0_98, %c0_99] : memref<1x32xf32, #tpu.memory_space<vmem>>, vector<1x32xf32>
      %221 = arith.addf %219, %220 : vector<1x32xf32>
      %222 = math.tanh %221 : vector<1x32xf32>
      %223 = arith.truncf %222 : vector<1x32xf32> to vector<1x32xbf16>
      %c0_100 = arith.constant 0 : index
      %c0_101 = arith.constant 0 : index
      %224 = vector.load %arg24[%c0_100, %c0_101] : memref<32x128xbf16, #tpu.memory_space<vmem>>, vector<32x128xbf16>
      %cst_102 = arith.constant dense<0.000000e+00> : vector<1x128xf32>
      %225 = tpu.matmul %223, %224, %cst_102 {dimension_numbers = #tpu.dot_dimension_numbers<[1], [0], [0], [1], [0, 0, 1, 1], [], []>} : vector<1x32xbf16>, vector<32x128xbf16>, vector<1x128xf32> -> vector<1x128xf32>
      %c0_103 = arith.constant 0 : index
      %c0_104 = arith.constant 0 : index
      %226 = vector.load %arg25[%c0_103, %c0_104] : memref<1x128xf32, #tpu.memory_space<vmem>>, vector<1x128xf32>
      %227 = arith.addf %225, %226 : vector<1x128xf32>
      %c0_105 = arith.constant 0 : index
      %c0_106 = arith.constant 0 : index
      %c0_107 = arith.constant 0 : index
      %228 = vector.load %arg26[%c0_105, %c0_106, %c0_107] : memref<1x1x128xf32, #tpu.memory_space<vmem>>, vector<1x1x128xf32>
      %229 = vector.shape_cast %228 : vector<1x1x128xf32> to vector<1x128xf32>
      %230 = vector.shape_cast %227 : vector<1x128xf32> to vector<1x1x128xf32>
      tpu.vector_store %arg26[%c0_105, %c0_106, %c0_107], %230 {strides = array<i32>} : memref<1x1x128xf32, #tpu.memory_space<vmem>>, vector<1x1x128xf32>,
    } else {
    }
    return
  }
  func.func @transform_0(%arg0: i32, %arg1: i32) -> (i32, i32, i32) {
    %c0_i32 = arith.constant 0 : i32
    %c0_i32_0 = arith.constant 0 : i32
    %c0_i32_1 = arith.constant 0 : i32
    return %arg0, %c0_i32, %c0_i32_0 : i32, i32, i32
  }
  func.func @transform_1(%arg0: i32, %arg1: i32) -> (i32, i32, i32) {
    %c0_i32 = arith.constant 0 : i32
    %c0_i32_0 = arith.constant 0 : i32
    %c0_i32_1 = arith.constant 0 : i32
    return %arg0, %c0_i32, %c0_i32_0 : i32, i32, i32
  }
  func.func @transform_2(%arg0: i32, %arg1: i32) -> (i32, i32) {
    %c0_i32 = arith.constant 0 : i32
    %c0_i32_0 = arith.constant 0 : i32
    %c0_i32_1 = arith.constant 0 : i32
    return %c0_i32, %c0_i32_0 : i32, i32
  }
  func.func @transform_3(%arg0: i32, %arg1: i32) -> (i32, i32) {
    %c0_i32 = arith.constant 0 : i32
    %c0_i32_0 = arith.constant 0 : i32
    %c0_i32_1 = arith.constant 0 : i32
    return %c0_i32, %c0_i32_0 : i32, i32
  }
  func.func @transform_4(%arg0: i32, %arg1: i32) -> (i32, i32, i32) {
    %c0_i32 = arith.constant 0 : i32
    %c0_i32_0 = arith.constant 0 : i32
    %c0_i32_1 = arith.constant 0 : i32
    return %arg1, %c0_i32, %c0_i32_0 : i32, i32, i32
  }
  func.func @transform_5(%arg0: i32, %arg1: i32) -> (i32, i32, i32) {
    %c0_i32 = arith.constant 0 : i32
    %c0_i32_0 = arith.constant 0 : i32
    %c0_i32_1 = arith.constant 0 : i32
    return %arg1, %c0_i32, %c0_i32_0 : i32, i32, i32
  }
  func.func @transform_6(%arg0: i32, %arg1: i32) -> (i32, i32, i32) {
    %c0_i32 = arith.constant 0 : i32
    %c0_i32_0 = arith.constant 0 : i32
    %c0_i32_1 = arith.constant 0 : i32
    return %arg1, %c0_i32, %c0_i32_0 : i32, i32, i32
  }
  func.func @transform_7(%arg0: i32, %arg1: i32) -> (i32, i32, i32) {
    %c0_i32 = arith.constant 0 : i32
    %c0_i32_0 = arith.constant 0 : i32
    %c0_i32_1 = arith.constant 0 : i32
    return %arg1, %c0_i32, %c0_i32_0 : i32, i32, i32
  }
  func.func @transform_8(%arg0: i32, %arg1: i32) -> (i32, i32, i32) {
    %c0_i32 = arith.constant 0 : i32
    %c0_i32_0 = arith.constant 0 : i32
    %c0_i32_1 = arith.constant 0 : i32
    return %arg1, %c0_i32, %c0_i32_0 : i32, i32, i32
  }
  func.func @transform_9(%arg0: i32, %arg1: i32) -> (i32, i32, i32) {
    %c0_i32 = arith.constant 0 : i32
    %c0_i32_0 = arith.constant 0 : i32
    %c0_i32_1 = arith.constant 0 : i32
    return %arg1, %c0_i32, %c0_i32_0 : i32, i32, i32
  }
  func.func @transform_10(%arg0: i32, %arg1: i32) -> (i32, i32, i32) {
    %c0_i32 = arith.constant 0 : i32
    %c0_i32_0 = arith.constant 0 : i32
    %c0_i32_1 = arith.constant 0 : i32
    return %arg1, %c0_i32, %c0_i32_0 : i32, i32, i32
  }
  func.func @transform_11(%arg0: i32, %arg1: i32) -> (i32, i32, i32) {
    %c0_i32 = arith.constant 0 : i32
    %c0_i32_0 = arith.constant 0 : i32
    %c0_i32_1 = arith.constant 0 : i32
    return %arg1, %c0_i32, %c0_i32_0 : i32, i32, i32
  }
  func.func @transform_12(%arg0: i32, %arg1: i32) -> (i32, i32, i32) {
    %c0_i32 = arith.constant 0 : i32
    %c0_i32_0 = arith.constant 0 : i32
    %c0_i32_1 = arith.constant 0 : i32
    return %arg1, %c0_i32, %c0_i32_0 : i32, i32, i32
  }
  func.func @transform_13(%arg0: i32, %arg1: i32) -> (i32, i32, i32) {
    %c0_i32 = arith.constant 0 : i32
    %c0_i32_0 = arith.constant 0 : i32
    %c0_i32_1 = arith.constant 0 : i32
    return %arg1, %c0_i32, %c0_i32_0 : i32, i32, i32
  }
  func.func @transform_14(%arg0: i32, %arg1: i32) -> (i32, i32, i32) {
    %c0_i32 = arith.constant 0 : i32
    %c0_i32_0 = arith.constant 0 : i32
    %c0_i32_1 = arith.constant 0 : i32
    return %arg1, %c0_i32, %c0_i32_0 : i32, i32, i32
  }
  func.func @transform_15(%arg0: i32, %arg1: i32) -> (i32, i32, i32) {
    %c0_i32 = arith.constant 0 : i32
    %c0_i32_0 = arith.constant 0 : i32
    %c0_i32_1 = arith.constant 0 : i32
    return %arg1, %c0_i32, %c0_i32_0 : i32, i32, i32
  }
  func.func @transform_16(%arg0: i32, %arg1: i32) -> (i32, i32, i32) {
    %c0_i32 = arith.constant 0 : i32
    %c0_i32_0 = arith.constant 0 : i32
    %c0_i32_1 = arith.constant 0 : i32
    return %arg1, %c0_i32, %c0_i32_0 : i32, i32, i32
  }
  func.func @transform_17(%arg0: i32, %arg1: i32) -> (i32, i32, i32) {
    %c0_i32 = arith.constant 0 : i32
    %c0_i32_0 = arith.constant 0 : i32
    %c0_i32_1 = arith.constant 0 : i32
    return %arg1, %c0_i32, %c0_i32_0 : i32, i32, i32
  }
  func.func @transform_18(%arg0: i32, %arg1: i32) -> (i32, i32, i32) {
    %c0_i32 = arith.constant 0 : i32
    %c0_i32_0 = arith.constant 0 : i32
    %c0_i32_1 = arith.constant 0 : i32
    return %arg1, %c0_i32, %c0_i32_0 : i32, i32, i32
  }
  func.func @transform_19(%arg0: i32, %arg1: i32) -> (i32, i32, i32) {
    %c0_i32 = arith.constant 0 : i32
    %c0_i32_0 = arith.constant 0 : i32
    %c0_i32_1 = arith.constant 0 : i32
    return %arg1, %c0_i32, %c0_i32_0 : i32, i32, i32
  }
  func.func @transform_20(%arg0: i32, %arg1: i32) -> (i32, i32) {
    %c0_i32 = arith.constant 0 : i32
    %c0_i32_0 = arith.constant 0 : i32
    %c0_i32_1 = arith.constant 0 : i32
    return %c0_i32, %c0_i32_0 : i32, i32
  }
  func.func @transform_21(%arg0: i32, %arg1: i32) -> (i32, i32) {
    %c0_i32 = arith.constant 0 : i32
    %c0_i32_0 = arith.constant 0 : i32
    %c0_i32_1 = arith.constant 0 : i32
    return %c0_i32, %c0_i32_0 : i32, i32
  }
  func.func @transform_22(%arg0: i32, %arg1: i32) -> (i32, i32) {
    %c0_i32 = arith.constant 0 : i32
    %c0_i32_0 = arith.constant 0 : i32
    %c0_i32_1 = arith.constant 0 : i32
    return %c0_i32, %c0_i32_0 : i32, i32
  }
  func.func @transform_23(%arg0: i32, %arg1: i32) -> (i32, i32) {
    %c0_i32 = arith.constant 0 : i32
    %c0_i32_0 = arith.constant 0 : i32
    %c0_i32_1 = arith.constant 0 : i32
    return %c0_i32, %c0_i32_0 : i32, i32
  }
  func.func @transform_24(%arg0: i32, %arg1: i32) -> (i32, i32, i32) {
    %c0_i32 = arith.constant 0 : i32
    %c0_i32_0 = arith.constant 0 : i32
    %c0_i32_1 = arith.constant 0 : i32
    return %arg0, %c0_i32, %c0_i32_0 : i32, i32, i32
  }
}

</mosaic_0001>

<bundles_post_ra>
// kernel: tpu_custom_call.1
= control target key start
LH: loop header
LB: loop body
LE: loop exit
PB: predicated region body
PF: predicated region fallthrough
CT: control target
= control target key end

     0   :  { %s4061_s0 = inlined_call_operand.hbm [shape: f32[2,8,32], index: 0, kind: input, shape index: {}]   ;;  %s4062_s1 = inlined_call_operand.hbm [shape: f32[2,1,8], index: 1, kind: input, shape index: {}]   ;;  %s4063_s2 = inlined_call_operand.vmem [shape: f32[1,32], index: 2, kind: input, shape index: {}]   ;;  %s4064_s3 = inlined_call_operand.hbm [shape: f32[1,32], index: 3, kind: input, shape index: {}]   ;;  %s4065_s4 = inlined_call_operand.vmem [shape: bf16[2,32,32], index: 4, kind: input, shape index: {}]   ;;  %s4066_s5 = inlined_call_operand.hbm [shape: f32[2,1,32], index: 5, kind: input, shape index: {}]   ;;  %s4067_s6 = inlined_call_operand.vmem [shape: bf16[2,32,32], index: 6, kind: input, shape index: {}]   ;;  %s4068_s7 = inlined_call_operand.hbm [shape: f32[2,1,32], index: 7, kind: input, shape index: {}]   ;;  %s4069_s8 = inlined_call_operand.vmem [shape: bf16[2,32,32], index: 8, kind: input, shape index: {}]   ;;  %s4070_s9 = inlined_call_operand.hbm [shape: f32[2,1,32], index: 9, kind: input, shape index: {}]   ;;  %s4071_s10 = inlined_call_operand.hbm [shape: bf16[2,32,32], index: 10, kind: input, shape index: {}]   ;;  %s4072_s11 = inlined_call_operand.hbm [shape: f32[2,1,32], index: 11, kind: input, shape index: {}]   ;;  %s4073_s12 = inlined_call_operand.hbm [shape: f32[2,1,32], index: 12, kind: input, shape index: {}]   ;;  %s4074_s13 = inlined_call_operand.hbm [shape: f32[2,1,32], index: 13, kind: input, shape index: {}]   ;;  %s4075_s14 = inlined_call_operand.hbm [shape: bf16[2,32,64], index: 14, kind: input, shape index: {}]   ;;  %s4076_s15 = inlined_call_operand.hbm [shape: f32[2,1,64], index: 15, kind: input, shape index: {}]   ;;  %s4077_s16 = inlined_call_operand.vmem [shape: bf16[2,64,32], index: 16, kind: input, shape index: {}]   ;;  %s4078_s17 = inlined_call_operand.hbm [shape: f32[2,1,32], index: 17, kind: input, shape index: {}]   ;;  %s4079_s18 = inlined_call_operand.hbm [shape: f32[2,1,32], index: 18, kind: input, shape index: {}]   ;;  %s4080_s19 = inlined_call_operand.hbm [shape: f32[2,1,32], index: 19, kind: input, shape index: {}]   ;;  %s4081_s20 = inlined_call_operand.vmem [shape: bf16[32,32], index: 20, kind: input, shape index: {}]   ;;  %s4082_s21 = inlined_call_operand.vmem [shape: f32[1,32], index: 21, kind: input, shape index: {}]   ;;  %s4083_s22 = inlined_call_operand.hbm [shape: bf16[32,128], index: 22, kind: input, shape index: {}]   ;;  %s4084_s23 = inlined_call_operand.vmem [shape: f32[1,128], index: 23, kind: input, shape index: {}]   ;;  %s4085_s24 = inlined_call_operand.hbm [shape: f32[2,1,128], index: 24, kind: output, shape index: {}]  }
   0x1   :  { %4108 = sst [smem:[#allocation53_spill]] %s4061_s0 }
   0x2   :  { %4109 = sst [smem:[#allocation54_spill]] %s4062_s1 }
   0x3   :  { %4110 = sst [smem:[#allocation55_spill]] %s4063_s2 }
   0x4   :  { %4111 = sst [smem:[#allocation56_spill]] %s4064_s3 }
   0x5   :  { %4112 = sst [smem:[#allocation57_spill]] %s4065_s4 }
   0x6   :  { %4113 = sst [smem:[#allocation58_spill]] %s4066_s5 }
   0x7   :  { %4114 = sst [smem:[#allocation59_spill]] %s4067_s6 }
   0x8   :  { %4115 = sst [smem:[#allocation60_spill]] %s4068_s7 }
   0x9   :  { %4116 = sst [smem:[#allocation61_spill]] %s4069_s8 }
   0xa   :  { %4117 = sst [smem:[#allocation62_spill]] %s4070_s9 }
   0xb   :  { %4118 = sst [smem:[#allocation63_spill]] %s4071_s10 }
   0xc   :  { %4119 = sst [smem:[#allocation64_spill]] %s4072_s11 }
   0xd   :  { %4120 = sst [smem:[#allocation65_spill]] %s4073_s12 }
   0xe   :  { %4121 = sst [smem:[#allocation66_spill]] %s4074_s13 }
   0xf   :  { %4122 = sst [smem:[#allocation67_spill]] %s4075_s14 }
  0x10   :  { %4123 = sst [smem:[#allocation68_spill]] %s4076_s15 }
  0x11   :  { %4124 = sst [smem:[#allocation69_spill]] %s4077_s16 }
  0x12   :  { %4125 = sst [smem:[#allocation70_spill]] %s4078_s17 }
  0x13   :  { %4126 = sst [smem:[#allocation71_spill]] %s4079_s18 }
  0x14   :  { %4127 = sst [smem:[#allocation72_spill]] %s4080_s19 }
  0x15   :  { %4128 = sst [smem:[#allocation73_spill]] %s4081_s20 }
  0x16   :  { %4129 = sst [smem:[#allocation74_spill]] %s4082_s21 }
  0x17   :  { %4130 = sst [smem:[#allocation75_spill]] %s4083_s22 }
  0x18   :  { %4131 = sst [smem:[#allocation76_spill]] %s4084_s23 }
  0x19   :  { %4132 = sst [smem:[#allocation77_spill]] %s4085_s24 }
  0x1a   :  { %29 = vsyncpa [#allocation4], 0 }
  0x1b   :  { %31 = vsyncpa [#allocation4 + $0x1], 0 }
  0x1c   :  { %32 = vsyncpa [#allocation7], 0 }
  0x1d   :  { %34 = vsyncpa [#allocation7 + $0x1], 0 }
  0x1e   :  { %35 = vsyncpa [#allocation10], 0 }
  0x1f   :  { %37 = vsyncpa [#allocation10 + $0x1], 0 }
  0x20   :  { %38 = vsyncpa [#allocation13], 0 }
  0x21   :  { %40 = vsyncpa [#allocation13 + $0x1], 0 }
  0x22   :  { %41 = vsyncpa [#allocation16], 0 }
  0x23   :  { %43 = vsyncpa [#allocation16 + $0x1], 0 }
  0x24   :  { %44 = vsyncpa [#allocation19], 0 }
  0x25   :  { %46 = vsyncpa [#allocation19 + $0x1], 0 }
  0x26   :  { %47 = vsyncpa [#allocation22], 0 }
  0x27   :  { %49 = vsyncpa [#allocation22 + $0x1], 0 }
  0x28   :  { %50 = vsyncpa [#allocation25], 0 }
  0x29   :  { %52 = vsyncpa [#allocation25 + $0x1], 0 }
  0x2a   :  { %53 = vsyncpa [#allocation28], 0 }
  0x2b   :  { %54 = vsyncpa [#allocation5], 0 }
  0x2c   :  { %56 = vsyncpa [#allocation5 + $0x1], 0  ;;  %s3508_s5 = smov 0   ;;  %s3510_s26 = smov 0  }
  0x2d   :  { %s3512_s27 = smov 0   ;;  %s3514_s28 = smov 0  }
  0x2e   :  { %s3516_s6 = smov 0   ;;  %s3518_s2 = smov 0  }
  0x2f   :  { %s3520_s29 = smov 0   ;;  %s3522_s0 = smov 0  }
  0x30   :  { %s3524_s7 = smov 0   ;;  %s3526_s30 = smov 0  }
  0x31   :  { %s3528_s3 = smov 0  }
  0x32 LB: > { %4133 = sst [smem:[#allocation41_spill]] %s3331_s26  ;;  %s3564_s25 = sadd.s32 4294967295, %s3367_s3   ;;  %s3367_s3 = sphi %s3528_s3, %s62_s3   ;;  %s3363_s30 = sphi %s3526_s30, %s4216_s30   ;;  %s3359_s7 = sphi %s3524_s7, %s4215_s7   ;;  %s3355_s0 = sphi %s3522_s0, %s4214_s0   ;;  %s3351_s29 = sphi %s3520_s29, %s4213_s29   ;;  %s3347_s2 = sphi %s3518_s2, %s4212_s2   ;;  %s3343_s6 = sphi %s3516_s6, %s4211_s6   ;;  %s3339_s28 = sphi %s3514_s28, %s4210_s28   ;;  %s3335_s27 = sphi %s3512_s27, %s4206_s27   ;;  %s3331_s26 = sphi %s3510_s26, %s4205_s26   ;;  %s3327_s5 = sphi %s3508_s5, %s4204_s5  }
  0x33   : > { %4134 = sst [smem:[#allocation42_spill]] %s3335_s27  ;;  %s2415_s8 = sadd.s32 4294967294, %s3367_s3  }
  0x34   : > { %4135 = sst [smem:[#allocation43_spill]] %s3339_s28  ;;  %s71_s4 = sadd.s32 1, %s3359_s7 }
  0x35   : > { %4136 = sst [smem:[#allocation44_spill]] %s3351_s29  ;;  %s74_s1 = sadd.s32 1, %s3363_s30 }
  0x36   : > { %4137 = sst [smem:[#allocation45_spill]] %s3355_s0  ;;  %p72_p0 = scmp.ge.s32.totalorder %s71_s4, 2 }
  0x37   : > { %s81_s24 = sadd.s32 1, %s3347_s2  ;;  %p4091_p1 = scmp.ne.s32.totalorder %s3347_s2, %s3343_s6 }
  0x38   : > { %p89_p2 = scmp.eq.s32.totalorder %s3367_s3, 0  ;;  %s4218_s4 = smov (%p72_p0, %s71_s4), 0 }
  0x39   : > { %4138 = sst [smem:[#allocation46_spill]] %s4218_s4  ;;  %s4220_s1 = smov (!%p72_p0, %s74_s1), %s3363_s30 }
  0x3a   : > { %p3581_p3 = por %p89_p2, %p4091_p1  ;;  %p4090_p4 = scmp.ne.s32.totalorder %s3343_s6, %s3339_s28 }
  0x3b   : > { %p76_p5 = scmp.ge.s32.totalorder %s4220_s1, 2  ;;  %p95_p6 = scmp.eq.s32.totalorder %s3564_s25, 0 }
  0x3c   : > { %s198_s23 = ssub.s32 %s3359_s7, %s4218_s4  ;;  %s201_s21 = sadd.s32 1, %s3335_s27 }
  0x3d   : > { %s4222_s1 = smov (%p76_p5, %s4220_s1), 0  ;;  %p3598_p7 = por %p95_p6, %p4090_p4 }
  0x3e   : > { %4140 = sst [smem:[#allocation47_spill]] %s4222_s1  ;;  %p199_p8 = scmp.eq.s32.totalorder %s198_s23, 0 }
  0x3f   : > { %s4141_s20 = scalar_select %p3598_p7, 1, 0 }
  0x40   : > { %s78_s16 = ssub.s32 %s3363_s30, %s4222_s1  ;;  %p208_p9 = scmp.ne.s32.totalorder %s3335_s27, %s3331_s26 }
  0x41   : > { %p79_p10 = scmp.eq.s32.totalorder %s78_s16, 0  ;;  %p214_p11 = scmp.ne.s32.totalorder %s3331_s26, %s3327_s5 }
  0x42   : > { %s3609_s4 = scalar_select %p199_p8, %s3335_s27, %s201_s21  }
  0x43   : > { %s3612_s29 = scalar_select %p79_p10, %s3347_s2, %s81_s24  }
  0x44   : > { %4142 = sst [smem:[#allocation48_spill]] %s3609_s4  ;;  %p3616_p12 = por %p208_p9, %p89_p2 }
  0x45   : > { %4143 = sst [smem:[#allocation49_spill]] %s3612_s29  ;;  %p3622_p13 = por %p214_p11, %p95_p6 }
  0x46   : > { %p686_p0 = scmp.eq.s32.totalorder %s3564_s25, 3  ;;  %p692_p5 = scmp.eq.s32.totalorder %s2415_s8, 3 }
  0x47   : > { %s4145_s17 = scalar_select %p3622_p13, 1, 0 }
  0x48   : > { %p2416_p4 = scmp.ge.s32.totalorder %s3367_s3, 1  ;;  %p699_p1 = scmp.lt.s32.totalorder %s3367_s3, 5 }
  0x49   : > { %4146 = sst [smem:[#allocation50_spill]] %s4145_s17  ;;  %p4147_p7 = scmp.ne.s32.totalorder %s3347_s2, %s3343_s6 }
  0x4a   : > { %p4150_p10 = scmp.ne.s32.totalorder %s3343_s6, %s3339_s28  ;;  %p3643_p9 = pnand %p2416_p4, %p699_p1 }
  0x4b   : > { %p3632_p8 = por %p686_p0, %p4147_p7  ;;  %s4154_s1 = sld [smem:[#allocation56_spill]] }
  0x4c   : > { %p3639_p2 = por %p692_p5, %p4150_p10  ;;  %p2596_p11 = pneg %p3643_p9 }
  0x4d   : > { %s4148_s16 = scalar_select %p3632_p8, 1, 0 }
  0x4e   : > { %s4151_s21 = scalar_select %p3639_p2, 1, 0 }
  0x4f   : > { %4149 = sst [smem:[#allocation51_spill]] %s4148_s16  ;;  %s3369_s29 = smov [#allocation8]  }
  0x50   : > { %4152 = sst [smem:[#allocation52_spill]] %s4151_s21  ;;  %s716_s4 = sshll.u32 %s3369_s29, 4  ;;  %s717_s4 = int_to_ptr.vmem [resolvable:$true] %s716_s4 }
  0x51   : > { %s714_s8 = sshll.u32 %s4154_s1, 4  ;;  %s4155_s22 = sld [smem:[#allocation75_spill]]  ;;  %s715_s8 = int_to_ptr.hbm [resolvable:$true] %s714_s8 }
  0x52   : > { %p2597_p1 = pnand %p2596_p11, %p95_p6  ;;  %s3370_s21 = smov [#allocation27]  }
  0x53   : > { %s733_s26 = sshll.u32 %s3370_s21, 4  ;;  %s3371_s24 = smov 64   ;;  %s734_s26 = int_to_ptr.vmem [resolvable:$true] %s733_s26 }
  0x54   : > { %2599 = dma.hbm_to_vmem [thread:$0]  (!%p2597_p1), %s715_s8, 16, %s717_s4, [#allocation7]  }
  0x55   : > { %s3372_s5 = smov 4   ;;  %p2419_p4 = scmp.ge.s32.totalorder %s3367_s3, 4 }
  0x56   : > { %s3659_s28 = sand.u32 (!%p2419_p4), 1, %s3367_s3   ;;  %s3662_s29 = sand.u32 (!%p2419_p4), 1, %s3335_s27  }
  0x57   : > { %s731_s17 = sshll.u32 %s4155_s22, 4  ;;  %746 = sbr.rel (%p2419_p4) target bundleno = 152 (0x98), region = 40  ;;  %s732_s17 = int_to_ptr.hbm [resolvable:$true] %s731_s17 }
  0x58   : > { %2602 = dma.hbm_to_vmem [thread:$0]  (!%p2597_p1), %s732_s17, 256, %s734_s26, [#allocation28], %s3371_s24, %s3371_s24, %s3372_s5  }
  0x59   : > { %s4156_s16 = sld [smem:[#allocation58_spill]] (!%p2419_p4)  ;;  %s797_s26 = scalar_lea.vmem (!%p2419_p4), [#allocation9], %s3662_s29 }
  0x5a   : > { %s804_s21 = sshll.u32 (!%p2419_p4), %s797_s26, 4  ;;  %s4102_s24 = scalar_lea.sflag (!%p2419_p4), [#allocation10], %s3659_s28  ;;  %s805_s21 = int_to_ptr.vmem [resolvable:$true] %s804_s21 }
  0x5b   : > { %s4157_s9 = sld [smem:[#allocation62_spill]] (!%p2419_p4)  ;;  %s4169_s0 = scalar_lea.sflag (!%p2419_p4), [#allocation16], %s3659_s28 }
  0x5c   : > { %s4158_s11 = sld [smem:[#allocation64_spill]] }
  0x5d   : > { %s4159_s13 = sld [smem:[#allocation66_spill]] }
  0x5e   : > { %s4160_s15 = sld [smem:[#allocation68_spill]] }
  0x5f   : > { %s800_s17 = scalar_lea.hbm %s4156_s16, %s3359_s7  ;;  %s847_s16 = scalar_lea.vmem [#allocation12], %s3662_s29 }
  0x60   : > { %s802_s8 = sshll.u32 %s800_s17, 4  ;;  %s854_s27 = sshll.u32 %s847_s16, 4  ;;  %s803_s8 = int_to_ptr.hbm [resolvable:$true] %s802_s8  ;;  %s855_s27 = int_to_ptr.vmem [resolvable:$true] %s854_s27 }
  0x61   : > { %2564 = dma.hbm_to_vmem [thread:$0]  (%p3616_p12), %s803_s8, 16, %s805_s21, %s4102_s24  }
  0x62   : > { %s850_s4 = scalar_lea.hbm %s4157_s9, %s3359_s7  ;;  %s4103_s17 = scalar_lea.sflag [#allocation13], %s3659_s28 }
  0x63   : > { %s852_s1 = sshll.u32 %s850_s4, 4  ;;  %s889_s22 = scalar_lea.hbm %s4158_s11, %s3359_s7  ;;  %s853_s1 = int_to_ptr.hbm [resolvable:$true] %s852_s1 }
  0x64   : > { %2566 = dma.hbm_to_vmem [thread:$0]  (%p3616_p12), %s853_s1, 16, %s855_s27, %s4103_s17  }
  0x65   : > { %s886_s8 = scalar_lea.vmem [#allocation15], %s3662_s29  ;;  %s891_s4 = sshll.u32 %s889_s22, 4  ;;  %s892_s4 = int_to_ptr.hbm [resolvable:$true] %s891_s4 }
  0x66   : > { %s893_s5 = sshll.u32 %s886_s8, 4  ;;  %s4104_s16 = scalar_lea.sflag [#allocation16], %s3659_s28  ;;  %s894_s5 = int_to_ptr.vmem [resolvable:$true] %s893_s5 }
  0x67   : > { %2568 = dma.hbm_to_vmem [thread:$0]  (%p3616_p12), %s892_s4, 16, %s894_s5, %s4104_s16  }
  0x68   : > { %s923_s1 = scalar_lea.hbm %s4159_s13, %s3359_s7  ;;  %s920_s21 = scalar_lea.vmem [#allocation18], %s3662_s29 }
  0x69   : > { %s925_s26 = sshll.u32 %s923_s1, 4  ;;  %s927_s17 = sshll.u32 %s920_s21, 4  ;;  %s926_s26 = int_to_ptr.hbm [resolvable:$true] %s925_s26  ;;  %s928_s17 = int_to_ptr.vmem [resolvable:$true] %s927_s17 }
  0x6a   : > { %s4105_s22 = scalar_lea.sflag [#allocation19], %s3659_s28  ;;  %s962_s24 = scalar_lea.hbm %s4160_s15, %s3359_s7 }
  0x6b   : > { %2570 = dma.hbm_to_vmem [thread:$0]  (%p3616_p12), %s926_s26, 16, %s928_s17, %s4105_s22  }
  0x6c   : > { %s959_s4 = scalar_lea.vmem [#allocation21], %s3662_s29  ;;  %s964_s1 = sshll.u32 %s962_s24, 4  ;;  %s965_s1 = int_to_ptr.hbm [resolvable:$true] %s964_s1 }
  0x6d   : > { %s966_s27 = sshll.u32 %s959_s4, 4  ;;  %s4106_s21 = scalar_lea.sflag [#allocation22], %s3659_s28  ;;  %s967_s27 = int_to_ptr.vmem [resolvable:$true] %s966_s27 }
  0x6e   : > { %2572 = dma.hbm_to_vmem [thread:$0]  (%p3616_p12), %s965_s1, 16, %s967_s27, %s4106_s21  }
  0x6f   : > { %s4161_s18 = sld [smem:[#allocation71_spill]]  ;;  %s1001_s8 = scalar_lea.vmem [#allocation24], %s3662_s29 }
  0x70   : > { %s1008_s5 = sshll.u32 %s1001_s8, 4  ;;  %s4107_s22 = scalar_lea.sflag [#allocation25], %s3659_s28  ;;  %s1009_s5 = int_to_ptr.vmem [resolvable:$true] %s1008_s5 }
  0x71   : > { %s750_s24 = sand.u32 1, %s3347_s2   ;;  %s2421_s4 = sshll.u32 %s3363_s30, 3 }
  0x72   : > { %s2420_s11 = sshll.u32 %s750_s24, 3  ;;  %s4162_s21 = sld [smem:[#allocation53_spill]] }
  0x73   : > { %s751_s13 = scalar_lea.sflag [#allocation4], %s750_s24  ;;  %s772_s27 = scalar_lea.vmem [#allocation6], %s750_s24 }
  0x74   : > { %s2534_s24 = sshll.u32 %s3359_s7, 4  ;;  %s4166_s10 = sld [smem:[#allocation63_spill]] }
  0x75   : > { %s1004_s17 = scalar_lea.hbm %s4161_s18, %s3359_s7  ;;  %s4167_s1 = scalar_lea.sflag [#allocation13], %s3659_s28 }
  0x76   : > { %s1006_s26 = sshll.u32 %s1004_s17, 4  ;;  %s754_s17 = scalar_lea.vmem [#allocation3], %s2420_s11  ;;  %s1007_s26 = int_to_ptr.hbm [resolvable:$true] %s1006_s26 }
  0x77   : > { %2574 = dma.hbm_to_vmem [thread:$0]  (%p3616_p12), %s1007_s26, 16, %s1009_s5, %s4107_s22  }
  0x78   : > { %s758_s9 = scalar_lea.hbm %s4162_s21, %s2421_s4  ;;  %s762_s8 = sshll.u32 %s754_s17, 4  ;;  %s763_s8 = int_to_ptr.vmem [resolvable:$true] %s762_s8 }
  0x79   : > { %s760_s16 = sshll.u32 %s758_s9, 4  ;;  %s4163_s22 = sld [smem:[#allocation54_spill]]  ;;  %s761_s16 = int_to_ptr.hbm [resolvable:$true] %s760_s16 }
  0x7a   : > { %2562 = dma.hbm_to_vmem [thread:$0]  (%p3581_p3), %s761_s16, 128, %s763_s8, %s751_s13  }
  0x7b   : > { %s779_s21 = sshll.u32 %s772_s27, 4  ;;  %s770_s11 = scalar_lea.sflag [#allocation7], %s3659_s28  ;;  %s780_s21 = int_to_ptr.vmem [resolvable:$true] %s779_s21 }
  0x7c   : > { %s4164_s17 = sld [smem:[#allocation60_spill]]  ;;  %s822_s13 = scalar_lea.vmem [#allocation11], %s3662_s29 }
  0x7d   : > { %s829_s16 = sshll.u32 %s822_s13, 4  ;;  %s870_s5 = scalar_lea.hbm %s4166_s10, %s2534_s24  ;;  %s830_s16 = int_to_ptr.vmem [resolvable:$true] %s829_s16 }
  0x7e   : > { %s4168_s12 = sld [smem:[#allocation65_spill]]  ;;  %s4171_s9 = scalar_lea.sflag [#allocation19], %s3659_s28 }
  0x7f   : > { %s775_s15 = scalar_lea.hbm %s4163_s22, %s3363_s30  ;;  %s2422_s22 = sshll.u32 %s3662_s29, 4 }
  0x80   : > { %s777_s4 = sshll.u32 %s775_s15, 4  ;;  %s4165_s15 = scalar_lea.sflag [#allocation10], %s3659_s28  ;;  %s778_s4 = int_to_ptr.hbm [resolvable:$true] %s777_s4 }
  0x81   : > { %2563 = dma.hbm_to_vmem [thread:$0]  (%p3581_p3), %s778_s4, 16, %s780_s21, %s770_s11  }
  0x82   : > { %s825_s18 = scalar_lea.hbm %s4164_s17, %s3359_s7  ;;  %s865_s27 = scalar_lea.vmem [#allocation14], %s2422_s22 }
  0x83   : > { %s827_s8 = sshll.u32 %s825_s18, 4  ;;  %s873_s21 = sshll.u32 %s865_s27, 4  ;;  %s828_s8 = int_to_ptr.hbm [resolvable:$true] %s827_s8  ;;  %s874_s21 = int_to_ptr.vmem [resolvable:$true] %s873_s21 }
  0x84   : > { %2565 = dma.hbm_to_vmem [thread:$0]  (%p3616_p12), %s828_s8, 16, %s830_s16, %s4165_s15  }
  0x85   : > { %s871_s4 = sshll.u32 %s870_s5, 4  ;;  %s3373_s18 = smov 64   ;;  %s872_s4 = int_to_ptr.hbm [resolvable:$true] %s871_s4 }
  0x86   : > { %s3374_s11 = smov 4   ;;  %s906_s13 = scalar_lea.hbm %s4168_s12, %s3359_s7 }
  0x87   : > { %2567 = dma.hbm_to_vmem [thread:$0]  (%p3616_p12), %s872_s4, 256, %s874_s21, %s4167_s1, %s3373_s18, %s3373_s18, %s3374_s11  }
  0x88   : > { %s903_s16 = scalar_lea.vmem [#allocation17], %s3662_s29  ;;  %s908_s15 = sshll.u32 %s906_s13, 4  ;;  %s909_s15 = int_to_ptr.hbm [resolvable:$true] %s908_s15 }
  0x89   : > { %s910_s8 = sshll.u32 %s903_s16, 4  ;;  %s4170_s14 = sld [smem:[#allocation67_spill]]  ;;  %s911_s8 = int_to_ptr.vmem [resolvable:$true] %s910_s8 }
  0x8a   : > { %2569 = dma.hbm_to_vmem [thread:$0]  (%p3616_p12), %s909_s15, 16, %s911_s8, %s4169_s0  }
  0x8b   : > { %s938_s21 = scalar_lea.vmem [#allocation20], %s2422_s22  ;;  %s4172_s16 = sld [smem:[#allocation70_spill]] }
  0x8c   : > { %s946_s4 = sshll.u32 %s938_s21, 4  ;;  %s984_s8 = scalar_lea.vmem [#allocation23], %s3662_s29  ;;  %s947_s4 = int_to_ptr.vmem [resolvable:$true] %s946_s4 }
  0x8d   : > { %s991_s15 = sshll.u32 %s984_s8, 4  ;;  %s4173_s22 = scalar_lea.sflag [#allocation22], %s3659_s28  ;;  %s992_s15 = int_to_ptr.vmem [resolvable:$true] %s991_s15 }
  0x8e   : > { %s4174_s5 = sld [smem:[#allocation72_spill]]  ;;  %s1018_s21 = scalar_lea.vmem [#allocation26], %s3662_s29 }
  0x8f   : > { %s943_s27 = scalar_lea.hbm %s4170_s14, %s2534_s24  ;;  %s1025_s12 = sshll.u32 %s1018_s21, 4  ;;  %s1026_s12 = int_to_ptr.vmem [resolvable:$true] %s1025_s12 }
  0x90   : > { %s944_s1 = sshll.u32 %s943_s27, 4  ;;  %s945_s1 = int_to_ptr.hbm [resolvable:$true] %s944_s1 }
  0x91   : > { %2571 = dma.hbm_to_vmem [thread:$0]  (%p3616_p12), %s945_s1, 256, %s947_s4, %s4171_s9, %s3373_s18, %s3373_s18, %s3374_s11  }
  0x92   : > { %s987_s10 = scalar_lea.hbm %s4172_s16, %s3359_s7  ;;  %s4175_s18 = scalar_lea.sflag [#allocation25], %s3659_s28 }
  0x93   : > { %s989_s0 = sshll.u32 %s987_s10, 4  ;;  %s990_s0 = int_to_ptr.hbm [resolvable:$true] %s989_s0 }
  0x94   : > { %2573 = dma.hbm_to_vmem [thread:$0]  (%p3616_p12), %s990_s0, 16, %s992_s15, %s4173_s22  }
  0x95   : > { %s1021_s27 = scalar_lea.hbm %s4174_s5, %s3359_s7 }
  0x96   : > { %s1023_s14 = sshll.u32 %s1021_s27, 4  ;;  %s1024_s14 = int_to_ptr.hbm [resolvable:$true] %s1023_s14 }
  0x97   : > { %2575 = dma.hbm_to_vmem [thread:$0]  (%p3616_p12), %s1024_s14, 16, %s1026_s12, %s4175_s18  }
  0x98 PF: > { %1034 = sbr.rel (%p3643_p9) target bundleno = 2659 (0xa63), region = 116  ;;  %s3793_s10 = sand.u32 (!%p3643_p9), 1, %s3343_s6  }
  0x99   : > { %s2429_s11 = sshll.u32 (!%p3643_p9), %s3793_s10, 3  ;;  %s1037_s4 = scalar_lea.sflag (!%p3643_p9), [#allocation4], %s3793_s10 }
  0x9a   : > { %s3797_s29 = scalar_lea.vmem (!%p3643_p9), [#allocation3], %s2429_s11  ;;  %p4176_p3 = scmp.ne.s32.totalorder (!%p3643_p9), %s4141_s20, 0 }
  0x9d   : > { %3282 = dma.done.wait (%p4176_p3), %s1037_s4, 128  }
  0x9e   : > { %3284 = vsyncadd (%p4176_p3), %s1037_s4, 4294967168  ;;  %s3804_s12 = sand.u32 1, %s3564_s25  }
  0x9f   : > { %s1047_s14 = scalar_lea.sflag [#allocation7], %s3804_s12 }
  0xa0   : > { %3286 = dma.done.wait (%p4176_p3), %s1047_s14, 16  }
  0xa1   : > { %3288 = vsyncadd (%p4176_p3), %s1047_s14, 4294967280 }
  0xa2   : > { %3290 = dma.done.wait (%p95_p6), [#allocation7], 16  }
  0xa3   : > { %3292 = vsyncadd (%p95_p6), [#allocation7], 4294967280  ;;  %s4177_s23 = sld [smem:[#allocation41_spill]]  ;;  %s1061_s9 = scalar_lea.sflag [#allocation10], %s3804_s12 }
  0xa9   : > { %s3817_s1 = sand.u32 1, %s4177_s23  }
  0xaa   : > { %s1063_s17 = scalar_lea.vmem [#allocation9], %s3817_s1 }
  0xab   : > { %3294 = dma.done.wait (%p3622_p13), %s1061_s9, 32  }
  0xac   : > { %3296 = vsyncadd (%p3622_p13), %s1061_s9, 4294967264  ;;  %s1079_s13 = scalar_lea.sflag [#allocation13], %s3804_s12 }
  0xad   : > { %3298 = dma.done.wait (%p3622_p13), %s1079_s13, 272  }
  0xae   : > { %3300 = vsyncadd (%p3622_p13), %s1079_s13, 4294967024  ;;  %s2431_s8 = sshll.u32 %s3817_s1, 4  ;;  %s1098_s0 = scalar_lea.sflag [#allocation16], %s3804_s12 }
  0xaf   : > { %s3833_s15 = scalar_lea.vmem [#allocation14], %s2431_s8 }
  0xb0   : > { %3302 = dma.done.wait (%p3622_p13), %s1098_s0, 32  }
  0xb1   : > { %3304 = vsyncadd (%p3622_p13), %s1098_s0, 4294967264  ;;  %s1116_s26 = scalar_lea.sflag [#allocation19], %s3804_s12 }
  0xb2   : > { %3306 = dma.done.wait (%p3622_p13), %s1116_s26, 272  }
  0xb3   : > { %3308 = vsyncadd (%p3622_p13), %s1116_s26, 4294967024  ;;  %s3848_s27 = scalar_lea.vmem [#allocation20], %s2431_s8  ;;  %s1135_s21 = scalar_lea.sflag [#allocation22], %s3804_s12 }
  0xb4   : > { %3310 = dma.done.wait (%p3622_p13), %s1135_s21, 32  }
  0xb5   : > { %3312 = vsyncadd (%p3622_p13), %s1135_s21, 4294967264  ;;  %s1153_s4 = scalar_lea.sflag [#allocation25], %s3804_s12 }
  0xb6   : > { %3314 = dma.done.wait (%p3622_p13), %s1153_s4, 32  }
  0xb7   : > { %3316 = vsyncadd (%p3622_p13), %s1153_s4, 4294967264 }
  0xb8   : > { %3318 = dma.done.wait (%p95_p6), [#allocation28], 256  }
  0xb9   : > { %3320 = vsyncadd (%p95_p6), [#allocation28], 4294967040  ;;  %s4179_s9 = sld [smem:[#allocation44_spill]] }
  0xba   : > { %s4180_s21 = sld [smem:[#allocation57_spill]] }
  0xbb   : > { %s4181_s23 = sld [smem:[#allocation59_spill]] }
  0xbc   : > { %s4182_s5 = sld [smem:[#allocation61_spill]] }
  0xbd   : > { %s4183_s19 = sld [smem:[#allocation69_spill]] }
  0xbf   : > { %p1308_p7 = scmp.lt.s32.totalorder %s4179_s9, 1  ;;  %p2442_p6 = scmp.ne.s32.totalorder %s4179_s9, 0 }
  0xc0   : > { %s4184_s16 = sld [smem:[#allocation55_spill]] (!%p2442_p6) }
  0xc1   : > { %s1309_s13 = scalar_select %p1308_p7, %s4179_s9, 1 }
  0xc2   : > { %1332 = sbr.rel (%p2442_p6) target bundleno = 469 (0x1d5), region = 184 }
  0xc3   : > { %s2536_s12 = sshll.u32 %s1309_s13, 4  ;;  %s2539_s8 = sshll.u32 %s1309_s13, 5 }
  0xc4   : > { %s3873_s28 = scalar_lea.vmem %s4180_s21, %s2536_s12  ;;  %s3878_s11 = scalar_lea.vmem %s4181_s23, %s2536_s12 }
  0xc5   : > { %s3883_s24 = scalar_lea.vmem %s4182_s5, %s2536_s12  ;;  %s3888_s20 = scalar_lea.vmem %s4183_s19, %s2539_s8 }
  0xc6   : > { %s1307_s13 = scalar_lea.vmem [#allocation29], %s3793_s10 }
  0xc7   : > { %v1333_v0 = vld [vmem:[%s3797_s29] sm:$0xff]  ;;  %vm1336_vm0 = vcmask 261120   ;;  %v3375_v2 = vmov 32.0   ;;  %v2714_v23 = vld [vmem:[%s4184_s16] ss:$0 sm:$0xff] }
  0xc8   : > { %v1337_v1 = vsel %vm1336_vm0, %v1333_v0, 0.0  ;;  %2716 = vrcp.f32 %v3375_v2  ;;  %v2715_v25 = vld [vmem:[#allocation8] ss:$0 sm:$0xff] }
  0xc9   : > { %1338 = vadd.xlane.f32.xlu0 %v1337_v1 }
  0xce   : > { %v2717_v3 = vpop.eup %2716 }
  0xcf   : > { %v1341_v4 = vmul.f32 32.0, %v2717_v3  ;;  %vm1345_vm1 = vweird.f32 %v2717_v3 }
  0xd1   : > { %v1342_v5 = vsub.f32 1.0, %v1341_v4 }
  0xd3   : > { %v1343_v6 = vmul.f32 %v2717_v3, %v1342_v5 }
  0xd5   : > { %v1344_v7 = vadd.f32 %v2717_v3, %v1343_v6 }
  0xd7   : > { %v1346_v8 = vsel %vm1345_vm1, %v2717_v3, %v1344_v7 }
 0x13c   : > { %v1339_v9 = vpop.xlane.xlu0 %1338 }
 0x13d   : > { %v1347_v10 = vmul.f32 %v1346_v8, %v1339_v9 }
 0x13f   : > { %v1348_v11 = vsub.f32 %v1333_v0, %v1347_v10 }
 0x141   : > { %v1349_v12 = vmul.f32 %v1348_v11, %v1348_v11 }
 0x143   : > { %v1350_v13 = vsel %vm1336_vm0, %v1349_v12, 0.0 }
 0x144   : > { %1351 = vadd.xlane.f32.xlu0 %v1350_v13 }
 0x1b7   : > { %v1352_v14 = vpop.xlane.xlu0 %1351 }
 0x1b8   : > { %v1353_v15 = vmul.f32 %v1352_v14, %v1346_v8 }
 0x1ba   : > { %v1354_v16 = vadd.f32 1e-12, %v1353_v15 }
 0x1bc   : > { %2718 = vrsqrt.f32 %v1354_v16  ;;  %vm1361_vm3 = vweird.f32 %v1354_v16 }
 0x1c2   : > { %v2719_v17 = vpop.eup %2718 }
 0x1c3   : > { %v1356_v18 = vmul.f32 %v2719_v17, %v1354_v16  ;;  %vm1362_vm2 = vweird.f32 %v2719_v17 }
 0x1c4   : > { %vm1363_vm4 = vmor %vm1361_vm3, %vm1362_vm2 }
 0x1c5   : > { %v1357_v19 = vmul.f32 %v2719_v17, %v1356_v18 }
 0x1c7   : > { %v1358_v20 = vmul.f32 0.5, %v1357_v19 }
 0x1c9   : > { %v1359_v21 = vsub.f32 1.5, %v1358_v20 }
 0x1cb   : > { %v1360_v22 = vmul.f32 %v2719_v17, %v1359_v21 }
 0x1cd   : > { %v1364_v24 = vsel %vm1363_vm4, %v2719_v17, %v1360_v22 }
 0x1ce   : > { %v1365_v26 = vmul.f32 %v1364_v24, %v1348_v11 }
 0x1d0   : > { %v1369_v27 = vmul.f32 %v2714_v23, %v1365_v26 }
 0x1d2   : > { %v1373_v28 = vadd.f32 %v2715_v25, %v1369_v27 }
 0x1d4   : > { %1374 = vst.msk [vmem:[#allocation2] sm:$0xff] %vm1336_vm0, %v1373_v28 }
 0x1d5 PF: > { %v2541_v29 = vld [vmem:[%s3873_s28 + $0x8] sm:$0xff]  ;;  %v2540_v31 = vld [vmem:[%s3873_s28] sm:$0xff]  ;;  %vm1398_vm5 = vcmask 261120   ;;  %s4185_s22 = scalar_lea.vmem [#allocation11], %s3817_s1  ;;  %vm1484_vm6 = vcmask 64512   ;;  %s3376_s5 = smov 112  }
 0x1d6   : > { %v2543_v30 = vld [vmem:[%s3878_s11 + $0x8] sm:$0xff]  ;;  %v2542_v32 = vld [vmem:[%s3878_s11] sm:$0xff]  ;;  %1408 = vmatpush.bf16.msra.mxu0 %v2541_v29  ;;  %s3377_s18 = smov 120   ;;  %s4186_s11 = scalar_lea.vmem [#allocation6], %s3793_s10  ;;  %vm1524_vm7 = vcmask 1043456   ;;  %vm1731_vm8 = vcmask 130048  }
 0x1d7   : > { %1441 = vmatpush.bf16.msra.mxu1 %v2543_v30  ;;  %v2720_v35 = vld [vmem:[%s1063_s17] ss:$0 sm:$0xff]  ;;  %s3378_s17 = smov 104   ;;  %v2545_v61 = vld [vmem:[%s3883_s24 + $0x8] sm:$0xff]  ;;  %s3379_s14 = smov 8   ;;  %vm1733_vm9 = vcmask 195584  }
 0x1d8   : > { %v2721_v36 = vld [vmem:[%s4185_s22] ss:$0 sm:$0xff]  ;;  %1474 = vmatpush.bf16.msra.mxu2 %v2545_v61  ;;  %s3380_s23 = smov 24   ;;  %s3381_s9 = smov 16   ;;  %vm1895_vm14 = vcmask 523264  }
 0x1d9   : > { %v2722_v55 = vld [vmem:[%s4186_s11] ss:$0 sm:$0xff]  ;;  %s4188_s12 = scalar_lea.vmem [#allocation15], %s3817_s1  ;;  %s4191_s8 = scalar_lea.vmem [#allocation21], %s3817_s1 }
 0x1da   : > { %1409 = vmatpush.bf16.msra.mxu0 %v2540_v31  ;;  %v2544_v62 = vld [vmem:[%s3883_s24] sm:$0xff]  ;;  %s4187_s24 = scalar_lea.vmem [#allocation12], %s3817_s1  ;;  %s4193_s0 = scalar_lea.vmem [#allocation24], %s3817_s1 }
 0x1db   : > { %v3903_v33 = vld [vmem:[#allocation2] sm:$0xff]  ;;  %1442 = vmatpush.bf16.msra.mxu1 %v2542_v32  ;;  %s4194_s26 = scalar_lea.vmem [#allocation26], %s3817_s1  ;;  %s4195_s21 = sld [smem:[#allocation44_spill]] }
 0x1dc   : > { %v1376_v34 = vpack.c.bf16 %v3903_v33, %v3903_v33  ;;  %1475 = vmatpush.bf16.msra.mxu2 %v2544_v62  ;;  %v2723_v19 = vld [vmem:[%s4187_s24] ss:$0 sm:$0xff] }
 0x1de   : > { %2451 = vmatmul.msk.bf16.vlgmr.msra.gmra.mxu0 %vm1398_vm5, %v1376_v34  ;;  %2460 = vmatmul.msk.bf16.vlgmr.msra.gmra.mxu1 %vm1398_vm5, %v1376_v34 }
 0x1df   : > { %2469 = vmatmul.msk.bf16.vlgmr.msra.gmra.mxu2 %vm1398_vm5, %v1376_v34 }
 0x1e1   : > { %p2513_p12 = scmp.ne.s32.totalorder %s4195_s21, 1 }
 0x1e2   : > { %s4196_s25 = sld [smem:[#allocation73_spill]] (!%p2513_p12) }
 0x1e3   : > { %s4197_s22 = sld [smem:[#allocation74_spill]] (!%p2513_p12) }
 0x25b   : > { %v1411_v37 = vpop.f32.mrf.mxu0  ;;  %v1444_v38 = vpop.f32.mrf.mxu1 }
 0x25c   : > { %v1412_v39 = vadd.f32 %v2720_v35, %v1411_v37  ;;  %v1445_v40 = vadd.f32 %v2721_v36, %v1444_v38 }
 0x25e   : > { %v1481_v41 = vpack.c.bf16 %v1412_v39, %v1412_v39  ;;  %v1482_v42 = vpack.c.bf16 %v1445_v40, %v1445_v40 }
 0x260   : > { %1604 = vrot.lane.b32.xlu1 %v1482_v42, %s3376_s5  ;;  %1545 = vrot.lane.b32.xlu0 %v1482_v42, %s3377_s18  ;;  %v1489_v43 = vsel %vm1484_vm6, %v1482_v42, 0 }
 0x261   : > { %1602 = vrot.lane.b32.xlu2 %v1481_v41, %s3376_s5  ;;  %1498 = vmatpush.bf16.xpose.msra.mxu3 %v1489_v43 }
 0x262   : > { %v1477_v20 = vpop.f32.mrf.mxu2 }
 0x263   : > { %v1413_v44 = vpop.f32.mrf.mxu0  ;;  %v1446_v45 = vpop.f32.mrf.mxu1  ;;  %v1478_v21 = vadd.f32 %v2723_v19, %v1477_v20 }
 0x265   : > { %v1483_v22 = vpack.c.bf16 %v1478_v21, %v1478_v21 }
 0x267   : > { %v1526_v23 = vsel %vm1524_vm7, %v1483_v22, 0 }
 0x268   : > { %1662 = vrot.lane.b32.xlu1 %v1482_v42, %s3378_s17  ;;  %1542 = vrot.lane.b32.xlu0 %v1481_v41, %s3377_s18 }
 0x269   : > { %1660 = vrot.lane.b32.xlu2 %v1481_v41, %s3378_s17  ;;  %2470 = vmatmul.msk.bf16.vlgmr.msra.gmra.mxu3 %vm1484_vm6, %v1481_v41 }
 0x26a   : > { %1535 = vmatpush.bf16.msrb.mxu0 %v1526_v23  ;;  %v1479_v25 = vpop.f32.mrf.mxu2 }
 0x2bb   : > { %v1603_v50 = vpop.permute.xlu2 %1602 }
 0x2c3   : > { %v1661_v54 = vpop.permute.xlu2 %1660 }
 0x2d2   : > { %v1605_v46 = vpop.permute.xlu1 %1604  ;;  %v1546_v47 = vpop.permute.xlu0 %1545 }
 0x2d3   : > { %v1551_v48 = vsel %vm1484_vm6, %v1546_v47, 0  ;;  %v1610_v49 = vsel %vm1484_vm6, %v1605_v46, 0 }
 0x2d4   : > { %1560 = vmatpush.bf16.xpose.msrb.mxu1 %v1551_v48  ;;  %1619 = vmatpush.bf16.xpose.msrb.mxu3 %v1610_v49 }
 0x2da   : > { %v1663_v51 = vpop.permute.xlu1 %1662  ;;  %v1543_v52 = vpop.permute.xlu0 %1542 }
 0x2db   : > { %v1668_v53 = vsel %vm1484_vm6, %v1663_v51, 0  ;;  %2472 = vmatmul.msk.bf16.vlgmr.msrb.gmra.mxu1 %vm1484_vm6, %v1543_v52  ;;  %2474 = vmatmul.msk.bf16.vlgmr.msrb.gmra.mxu3 %vm1484_vm6, %v1603_v50 }
 0x2dc   : > { %1677 = vmatpush.bf16.xpose.msra.mxu1 %v1668_v53 }
 0x2eb   : > { %2476 = vmatmul.msk.bf16.vlgmr.msra.gmra.mxu1 %vm1484_vm6, %v1661_v54 }
 0x2ec   : > { %v1500_v56 = vpop.f32.mrf.mxu3 }
 0x2ed   : > { %v1504_v57 = vmul.f32 0.35355338, %v1500_v56 }
 0x2ef   : > { %v1508_v58 = vadd.f32 %v2722_v55, %v1504_v57 }
 0x2f1   : > { %v1509_v59 = vsel %vm1484_vm6, %v1508_v58, -inf }
 0x2f2   : > { %1510 = vmax.xlane.f32.xlu1 %v1509_v59 }
 0x2f4   : > { %v1502_v60 = vpop.f32.mrf.mxu3 }
 0x358   : > { %v1562_v63 = vpop.f32.mrf.mxu1 }
 0x359   : > { %v1566_v0 = vmul.f32 0.35355338, %v1562_v63 }
 0x35b   : > { %v1567_v1 = vadd.f32 %v2722_v55, %v1566_v0 }
 0x35d   : > { %v1568_v2 = vsel %vm1484_vm6, %v1567_v1, -inf }
 0x35e   : > { %1569 = vmax.xlane.f32.xlu0 %v1568_v2  ;;  %v1621_v3 = vpop.f32.mrf.mxu3 }
 0x35f   : > { %v1625_v12 = vmul.f32 0.35355338, %v1621_v3 }
 0x360   : > { %v1564_v4 = vpop.f32.mrf.mxu1 }
 0x361   : > { %v1626_v17 = vadd.f32 %v2722_v55, %v1625_v12 }
 0x363   : > { %v1627_v18 = vsel %vm1484_vm6, %v1626_v17, -inf }
 0x365   : > { %v1511_v5 = vpop.xlane.xlu1 %1510 }
 0x366   : > { %v1512_v6 = vsub.f32 %v1508_v58, %v1511_v5  ;;  %v1623_v7 = vpop.f32.mrf.mxu3 }
 0x367   : > { %v2547_v7 = vld [vmem:[%s3833_s15 + $0x8] sm:$0xff] }
 0x368   : > { %v1513_v8 = vmul.f32 1.442695, %v1512_v6  ;;  %v1679_v9 = vpop.f32.mrf.mxu1  ;;  %1765 = vmatpush.bf16.msra.mxu3 %v2547_v7 }
 0x369   : > { %v1683_v10 = vmul.f32 0.35355338, %v1679_v9 }
 0x36a   : > { %2731 = vpow2.f32 %v1513_v8  ;;  %v2546_v8 = vld [vmem:[%s3833_s15] sm:$0xff]  ;;  %s4189_s15 = scalar_lea.vmem [#allocation17], %s3817_s1 }
 0x36b   : > { %v1684_v11 = vadd.f32 %v2722_v55, %v1683_v10 }
 0x36c   : > { %1766 = vmatpush.bf16.msra.mxu3 %v2546_v8 }
 0x36d   : > { %v1685_v13 = vsel %vm1484_vm6, %v1684_v11, -inf }
 0x36e   : > { %1686 = vmax.xlane.f32.xlu2 %v1685_v13 }
 0x370   : > { %v2732_v14 = vpop.eup %2731  ;;  %v1681_v15 = vpop.f32.mrf.mxu1 }
 0x371   : > { %v1515_v16 = vsel %vm1484_vm6, %v2732_v14, 0.0 }
 0x372   : > { %1516 = vadd.xlane.f32.xlu1 %v1515_v16  ;;  %v2724_v16 = vld [vmem:[%s4188_s12] ss:$0 sm:$0xff] }
 0x376   : > { %1628 = vmax.xlane.f32.xlu2 %v1627_v18 }
 0x38e   : > { %1581 = vrot.lane.b32.xlu2 %v1483_v22, %s3377_s18 }
 0x3d1   : > { %v1570_v24 = vpop.xlane.xlu0 %1569 }
 0x3d2   : > { %v1571_v26 = vsub.f32 %v1567_v1, %v1570_v24 }
 0x3d4   : > { %v1572_v27 = vmul.f32 1.442695, %v1571_v26 }
 0x3d6   : > { %2733 = vpow2.f32 %v1572_v27 }
 0x3dc   : > { %v2734_v28 = vpop.eup %2733 }
 0x3dd   : > { %v1574_v29 = vsel %vm1484_vm6, %v2734_v28, 0.0 }
 0x3de   : > { %1575 = vadd.xlane.f32.xlu0 %v1574_v29 }
 0x3e1   : > { %v1687_v30 = vpop.xlane.xlu2 %1686 }
 0x3e2   : > { %v1688_v31 = vsub.f32 %v1684_v11, %v1687_v30 }
 0x3e4   : > { %v1689_v32 = vmul.f32 1.442695, %v1688_v31 }
 0x3e5   : > { %v1517_v34 = vpop.xlane.xlu1 %1516 }
 0x3e6   : > { %2735 = vpow2.f32 %v1689_v32 }
 0x3e7   : > { %2737 = vrcp.f32 %v1517_v34  ;;  %v2549_v34 = vld [vmem:[%s3848_s27 + $0x8] sm:$0xff] }
 0x3e9   : > { %v1629_v35 = vpop.xlane.xlu2 %1628 }
 0x3ea   : > { %v1630_v36 = vsub.f32 %v1626_v17, %v1629_v35  ;;  %v2548_v35 = vld [vmem:[%s3848_s27] sm:$0xff]  ;;  %s4190_s27 = scalar_lea.vmem [#allocation18], %s3817_s1 }
 0x3ec   : > { %v2736_v37 = vpop.eup %2735  ;;  %v1631_v38 = vmul.f32 1.442695, %v1630_v36 }
 0x3ed   : > { %v2738_v39 = vpop.eup %2737  ;;  %v1691_v40 = vsel %vm1484_vm6, %v2736_v37, 0.0 }
 0x3ee   : > { %v1519_v41 = vmul.f32 %v2738_v39, %v2732_v14  ;;  %2739 = vpow2.f32 %v1631_v38  ;;  %1692 = vadd.xlane.f32.xlu0 %v1691_v40 }
 0x3f0   : > { %v1520_v42 = vpack.c.bf16 %v1519_v41, %v1519_v41 }
 0x3f1   : > { %v1582_v45 = vpop.permute.xlu2 %1581 }
 0x3f2   : > { %2471 = vmatmul.msk.bf16.vlgmr.msrb.gmra.mxu0 %vm1484_vm6, %v1520_v42  ;;  %v1587_v46 = vsel %vm1524_vm7, %v1582_v45, 0  ;;  %v2725_v45 = vld [vmem:[%s4189_s15] ss:$0 sm:$0xff] }
 0x3f3   : > { %1596 = vmatpush.bf16.msrb.mxu2 %v1587_v46 }
 0x3f4   : > { %v2740_v43 = vpop.eup %2739 }
 0x3f5   : > { %v1633_v44 = vsel %vm1484_vm6, %v2740_v43, 0.0 }
 0x3f6   : > { %1634 = vadd.xlane.f32.xlu1 %v1633_v44 }
 0x402   : > { %1697 = vrot.lane.b32.xlu0 %v1483_v22, %s3378_s17  ;;  %s4198_s17 = sld [smem:[#allocation76_spill]] (!%p2513_p12) }
 0x40f   : > { %1639 = vrot.lane.b32.xlu1 %v1483_v22, %s3376_s5  ;;  %v3382_v22 = vmov 32.0  }
 0x451   : > { %v1576_v47 = vpop.xlane.xlu0 %1575 }
 0x452   : > { %2741 = vrcp.f32 %v1576_v47  ;;  %v2726_v47 = vld [vmem:[%s4190_s27] ss:$0 sm:$0xff] }
 0x458   : > { %v2742_v48 = vpop.eup %2741 }
 0x459   : > { %v1578_v49 = vmul.f32 %v2742_v48, %v2734_v28 }
 0x45b   : > { %v1579_v50 = vpack.c.bf16 %v1578_v49, %v1578_v49 }
 0x45d   : > { %2473 = vmatmul.msk.bf16.vlgmr.msrb.gmra.mxu2 %vm1484_vm6, %v1579_v50 }
 0x461   : > { %v1693_v51 = vpop.xlane.xlu0 %1692 }
 0x462   : > { %2743 = vrcp.f32 %v1693_v51 }
 0x468   : > { %v2744_v53 = vpop.eup %2743 }
 0x469   : > { %v1695_v54 = vmul.f32 %v2744_v53, %v2736_v37  ;;  %v1635_v55 = vpop.xlane.xlu1 %1634  ;;  %v2552_v53 = vld [vmem:[%s3888_s20 + $0x10] sm:$0xff] }
 0x46a   : > { %2745 = vrcp.f32 %v1635_v55  ;;  %v2550_v55 = vld [vmem:[%s3888_s20] sm:$0xff] }
 0x46b   : > { %v1696_v58 = vpack.c.bf16 %v1695_v54, %v1695_v54  ;;  %2747 = vrcp.f32 %v3382_v22  ;;  %v2551_v54 = vld [vmem:[%s3888_s20 + $0x8] sm:$0xff] }
 0x46f   : > { %v1537_v52 = vpop.f32.mrf.mxu0 }
 0x470   : > { %v2746_v60 = vpop.eup %2745 }
 0x471   : > { %v1637_v61 = vmul.f32 %v2746_v60, %v2740_v43  ;;  %v2748_v23 = vpop.eup %2747 }
 0x472   : > { %v1779_v24 = vmul.f32 32.0, %v2748_v23  ;;  %vm1783_vm10 = vweird.f32 %v2748_v23 }
 0x473   : > { %v1638_v0 = vpack.c.bf16 %v1637_v61, %v1637_v61 }
 0x474   : > { %v1698_v56 = vpop.permute.xlu0 %1697  ;;  %v1780_v25 = vsub.f32 1.0, %v1779_v24 }
 0x475   : > { %v1703_v57 = vsel %vm1524_vm7, %v1698_v56, 0  ;;  %v2727_v56 = vld [vmem:[%s4191_s8] ss:$0 sm:$0xff] }
 0x476   : > { %1712 = vmatpush.bf16.msra.mxu2 %v1703_v57  ;;  %v1781_v26 = vmul.f32 %v2748_v23, %v1780_v25 }
 0x477   : > { %v1539_v59 = vpop.f32.mrf.mxu0 }
 0x478   : > { %v1782_v27 = vadd.f32 %v2748_v23, %v1781_v26  ;;  %v2729_v26 = vld [vmem:[%s4193_s0] ss:$0 sm:$0xff] }
 0x479   : > { %2477 = vmatmul.msk.bf16.vlgmr.msra.gmra.mxu2 %vm1484_vm6, %v1696_v58 }
 0x47a   : > { %v3961_v28 = vsel %vm1783_vm10, %v2748_v23, %v1782_v27 }
 0x481   : > { %v1640_v62 = vpop.permute.xlu1 %1639 }
 0x482   : > { %v1645_v63 = vsel %vm1524_vm7, %v1640_v62, 0 }
 0x483   : > { %1654 = vmatpush.bf16.msra.mxu0 %v1645_v63 }
 0x486   : > { %2475 = vmatmul.msk.bf16.vlgmr.msra.gmra.mxu0 %vm1484_vm6, %v1638_v0 }
 0x487   : > { %1842 = vmatpush.bf16.msrb.mxu0 %v2549_v34 }
 0x48b   : > { %1843 = vmatpush.bf16.msrb.mxu0 %v2548_v35 }
 0x4e0   : > { %v1598_v1 = vpop.f32.mrf.mxu2 }
 0x4e1   : > { %1719 = vrot.lane.b32.xlu2 %v1598_v1, %s3379_s14 }
 0x4e8   : > { %v1600_v2 = vpop.f32.mrf.mxu2 }
 0x4fc   : > { %v1714_v3 = vpop.f32.mrf.mxu2 }
 0x4fd   : > { %1727 = vrot.lane.b32.xlu2 %v1714_v3, %s3380_s23 }
 0x503   : > { %v1656_v4 = vpop.f32.mrf.mxu0 }
 0x504   : > { %1723 = vrot.lane.b32.xlu0 %v1656_v4, %s3381_s9  ;;  %v1716_v5 = vpop.f32.mrf.mxu2 }
 0x50b   : > { %v1658_v6 = vpop.f32.mrf.mxu0 }
 0x53b   : > { %v1720_v9 = vpop.permute.xlu2 %1719 }
 0x53c   : > { %v1730_v10 = vsel %vm1484_vm6, %v1537_v52, %v1720_v9  ;;  %v2553_v52 = vld [vmem:[%s3888_s20 + $0x18] sm:$0xff]  ;;  %s4192_s20 = scalar_lea.vmem [#allocation23], %s3817_s1 }
 0x53d   : > { %1903 = vmatpush.bf16.msrb.mxu1 %v2553_v52  ;;  %v2728_v6 = vld [vmem:[%s4192_s20] ss:$0 sm:$0xff] }
 0x541   : > { %1904 = vmatpush.bf16.msrb.mxu1 %v2552_v53 }
 0x545   : > { %1905 = vmatpush.bf16.msrb.mxu1 %v2551_v54 }
 0x549   : > { %1906 = vmatpush.bf16.msrb.mxu1 %v2550_v55 }
 0x557   : > { %v1728_v12 = vpop.permute.xlu2 %1727 }
 0x576   : > { %v1724_v11 = vpop.permute.xlu0 %1723 }
 0x577   : > { %v1732_v13 = vsel %vm1731_vm8, %v1730_v10, %v1724_v11 }
 0x578   : > { %v1734_v14 = vsel %vm1733_vm9, %v1732_v13, %v1728_v12 }
 0x579   : > { %v1735_v15 = vpack.c.bf16 %v1734_v14, %v1734_v14 }
 0x57b   : > { %2486 = vmatmul.msk.bf16.vlgmr.msra.gmra.mxu3 %vm1398_vm5, %v1735_v15 }
 0x5fe   : > { %v1768_v17 = vpop.f32.mrf.mxu3 }
 0x5ff   : > { %v1769_v18 = vadd.f32 %v2724_v16, %v1768_v17 }
 0x601   : > { %v1772_v19 = vadd.f32 %v1769_v18, %v3903_v33 }
 0x603   : > { %v1775_v20 = vsel %vm1398_vm5, %v1772_v19, 0.0 }
 0x604   : > { %1776 = vadd.xlane.f32.xlu1 %v1775_v20 }
 0x606   : > { %v1770_v21 = vpop.f32.mrf.mxu3 }
 0x677   : > { %v1777_v29 = vpop.xlane.xlu1 %1776 }
 0x678   : > { %v1785_v30 = vmul.f32 %v3961_v28, %v1777_v29  ;;  %v2730_v29 = vld [vmem:[%s4194_s26] ss:$0 sm:$0xff] }
 0x67a   : > { %v1786_v33 = vsub.f32 %v1772_v19, %v1785_v30 }
 0x67c   : > { %v1787_v31 = vmul.f32 %v1786_v33, %v1786_v33 }
 0x67e   : > { %v1788_v32 = vsel %vm1398_vm5, %v1787_v31, 0.0 }
 0x67f   : > { %1789 = vadd.xlane.f32.xlu0 %v1788_v32 }
 0x6f2   : > { %v1790_v36 = vpop.xlane.xlu0 %1789 }
 0x6f3   : > { %v1791_v37 = vmul.f32 %v1790_v36, %v3961_v28 }
 0x6f5   : > { %v1792_v38 = vadd.f32 1e-12, %v1791_v37 }
 0x6f7   : > { %2749 = vrsqrt.f32 %v1792_v38  ;;  %vm1799_vm12 = vweird.f32 %v1792_v38 }
 0x6fd   : > { %v2750_v39 = vpop.eup %2749 }
 0x6fe   : > { %v1794_v40 = vmul.f32 %v2750_v39, %v1792_v38  ;;  %vm1800_vm11 = vweird.f32 %v2750_v39 }
 0x6ff   : > { %vm1801_vm13 = vmor %vm1799_vm12, %vm1800_vm11 }
 0x700   : > { %v1795_v41 = vmul.f32 %v2750_v39, %v1794_v40 }
 0x702   : > { %v1796_v42 = vmul.f32 0.5, %v1795_v41 }
 0x704   : > { %v1797_v43 = vsub.f32 1.5, %v1796_v42 }
 0x706   : > { %v1798_v44 = vmul.f32 %v2750_v39, %v1797_v43 }
 0x708   : > { %v1802_v46 = vsel %vm1801_vm13, %v2750_v39, %v1798_v44 }
 0x709   : > { %v1803_v48 = vmul.f32 %v1802_v46, %v1786_v33 }
 0x70b   : > { %v1807_v49 = vmul.f32 %v2725_v45, %v1803_v48 }
 0x70d   : > { %v1811_v50 = vadd.f32 %v2726_v47, %v1807_v49 }
 0x70f   : > { %v1812_v51 = vpack.c.bf16 %v1811_v50, %v1811_v50 }
 0x711   : > { %2495 = vmatmul.msk.bf16.vlgmr.msrb.gmra.mxu0 %vm1398_vm5, %v1812_v51 }
 0x78e   : > { %v1845_v57 = vpop.f32.mrf.mxu0 }
 0x78f   : > { %v1846_v58 = vadd.f32 %v2727_v56, %v1845_v57 }
 0x791   : > { %v1850_v59 = vmul.f32 0.044715, %v1846_v58  ;;  %v1849_v2 = vmul.f32 0.5, %v1846_v58 }
 0x793   : > { %v1851_v60 = vmul.f32 %v1850_v59, %v1846_v58 }
 0x795   : > { %v1852_v61 = vmul.f32 %v1851_v60, %v1846_v58 }
 0x796   : > { %v1847_v62 = vpop.f32.mrf.mxu0 }
 0x797   : > { %v1853_v63 = vadd.f32 %v1852_v61, %v1846_v58 }
 0x799   : > { %v1854_v0 = vmul.f32 0.7978846, %v1853_v63 }
 0x79b   : > { %2751 = vtanh.f32 %v1854_v0 }
 0x7a1   : > { %v2752_v1 = vpop.eup %2751 }
 0x7a2   : > { %v1856_v3 = vadd.f32 1.0, %v2752_v1 }
 0x7a4   : > { %v1857_v4 = vmul.f32 %v1856_v3, %v1849_v2 }
 0x7a6   : > { %v1858_v5 = vpack.c.bf16 %v1857_v4, %v1857_v4 }
 0x7a8   : > { %2512 = vmatmul.msk.bf16.vlgmr.msrb.gmra.mxu1 %vm1895_vm14, %v1858_v5 }
 0x825   : > { %v1908_v7 = vpop.f32.mrf.mxu1 }
 0x826   : > { %v1909_v8 = vadd.f32 %v2728_v6, %v1908_v7 }
 0x828   : > { %v1912_v9 = vadd.f32 %v1909_v8, %v1811_v50 }
 0x82a   : > { %v1915_v10 = vsel %vm1398_vm5, %v1912_v9, 0.0 }
 0x82b   : > { %1916 = vadd.xlane.f32.xlu2 %v1915_v10 }
 0x82d   : > { %v1910_v11 = vpop.f32.mrf.mxu1 }
 0x89e   : > { %v1917_v12 = vpop.xlane.xlu2 %1916 }
 0x89f   : > { %v1918_v13 = vmul.f32 %v1917_v12, %v3961_v28 }
 0x8a1   : > { %v1919_v14 = vsub.f32 %v1912_v9, %v1918_v13 }
 0x8a3   : > { %v1920_v15 = vmul.f32 %v1919_v14, %v1919_v14 }
 0x8a5   : > { %v1921_v16 = vsel %vm1398_vm5, %v1920_v15, 0.0 }
 0x8a6   : > { %1922 = vadd.xlane.f32.xlu1 %v1921_v16 }
 0x919   : > { %v1923_v17 = vpop.xlane.xlu1 %1922 }
 0x91a   : > { %v1924_v18 = vmul.f32 %v1923_v17, %v3961_v28 }
 0x91c   : > { %v1925_v19 = vadd.f32 1e-12, %v1924_v18 }
 0x91e   : > { %2753 = vrsqrt.f32 %v1925_v19  ;;  %vm1932_vm0 = vweird.f32 %v1925_v19 }
 0x924   : > { %v2754_v20 = vpop.eup %2753 }
 0x925   : > { %v1927_v21 = vmul.f32 %v2754_v20, %v1925_v19  ;;  %vm1933_vm15 = vweird.f32 %v2754_v20 }
 0x926   : > { %vm1934_vm1 = vmor %vm1932_vm0, %vm1933_vm15 }
 0x927   : > { %v1928_v22 = vmul.f32 %v2754_v20, %v1927_v21 }
 0x929   : > { %v1929_v23 = vmul.f32 0.5, %v1928_v22 }
 0x92b   : > { %v1930_v24 = vsub.f32 1.5, %v1929_v23 }
 0x92d   : > { %v1931_v25 = vmul.f32 %v2754_v20, %v1930_v24 }
 0x92f   : > { %v1935_v27 = vsel %vm1934_vm1, %v2754_v20, %v1931_v25 }
 0x930   : > { %v1936_v30 = vmul.f32 %v1935_v27, %v1919_v14 }
 0x932   : > { %v1940_v33 = vmul.f32 %v2729_v26, %v1936_v30  ;;  %1949 = sbr.rel (%p2513_p12) target bundleno = 2638 (0xa4e), region = 188 }
 0x934   : > { %v1944_v31 = vadd.f32 %v2730_v29, %v1940_v33 }
 0x936   : > { %1945 = vst.msk [vmem:[#allocation2] sm:$0xff] %vm1398_vm5, %v1944_v31 }
 0x937   : > { %v2555_v28 = vld [vmem:[%s4196_s25 + $0x8] sm:$0xff]  ;;  %v2554_v32 = vld [vmem:[%s4196_s25] sm:$0xff]  ;;  %v1950_v34 = vpack.c.bf16 %v1944_v31, %v1944_v31  ;;  %v2557_v35 = vld [vmem:[#allocation27 + $0x8] sm:$0xff] }
 0x938   : > { %1977 = vmatpush.bf16.msra.mxu0 %v2555_v28  ;;  %2012 = vmatpush.bf16.msra.mxu1 %v2557_v35  ;;  %v2556_v36 = vld [vmem:[#allocation27] sm:$0xff]  ;;  %v1955_v37 = vld [vmem:[%s4197_s22] sm:$0x1] }
 0x939   : > { %v1990_v43 = vld [vmem:[%s4198_s17] sm:$0x1] }
 0x93c   : > { %1978 = vmatpush.bf16.msra.mxu0 %v2554_v32  ;;  %2013 = vmatpush.bf16.msra.mxu1 %v2556_v36 }
 0x93f   : > { %2522 = vmatmul.msk.bf16.vlgmr.msra.gmra.mxu0 %vm1398_vm5, %v1950_v34 }
 0x9bc   : > { %v1980_v38 = vpop.f32.mrf.mxu0 }
 0x9bd   : > { %v1981_v39 = vadd.f32 %v1980_v38, %v1955_v37 }
 0x9bf   : > { %2755 = vtanh.f32 %v1981_v39 }
 0x9c4   : > { %v1982_v40 = vpop.f32.mrf.mxu0 }
 0x9c5   : > { %v2756_v41 = vpop.eup %2755 }
 0x9c6   : > { %v1985_v42 = vpack.c.bf16 %v2756_v41, %v2756_v41 }
 0x9c8   : > { %2531 = vmatmul.msk.bf16.vlgmr.msra.gmra.mxu1 %vm1398_vm5, %v1985_v42 }
 0xa45   : > { %v2015_v44 = vpop.f32.mrf.mxu1 }
 0xa46   : > { %v2016_v45 = vadd.f32 %v2015_v44, %v1990_v43 }
 0xa48   : > { %2019 = vst [vmem:[%s1307_s13] sm:$0x1] %v2016_v45 }
 0xa4d   : > { %v2017_v46 = vpop.f32.mrf.mxu1 }
 0xa4e PF: > { %s4199_s11 = sld [smem:[#allocation45_spill]]  ;;  %s2031_s15 = sshll.u32 %s1307_s13, 4  ;;  %s2032_s15 = int_to_ptr.vmem [resolvable:$true] %s2031_s15 }
 0xa4f   : > { %s4200_s23 = sld [smem:[#allocation77_spill]]  ;;  %s2021_s8 = scalar_lea.sflag [#allocation5], %s3793_s10 }
 0xa55   : > { %s2029_s12 = scalar_lea.hbm %s4200_s23, %s4199_s11  ;;  %s3229_s28 = scalar_lea.hbm %s4200_s23, 2 }
 0xa56   : > { %s2033_s27 = sshll.u32 %s2029_s12, 4  ;;  %s2034_s27 = int_to_ptr.hbm [resolvable:$true] %s2033_s27 }
 0xa57   : > { %s3223_s20 = sshra.s32 %s2034_s27, 4  ;;  %s3224_s20 = int_to_ptr.hbm [resolvable:$true] %s3223_s20 }
 0xa58   : > { %s3225_s0 = scalar_lea.hbm %s3224_s20, 1  ;;  %p3230_p10 = scmp.lt.s32.totalorder %s3224_s20, %s4200_s23 }
 0xa59   : > { %p3226_p13 = scmp.ne.s32.totalorder %s3224_s20, %s3225_s0  ;;  %p3231_p9 = scmp.lt.s32.totalorder %s3229_s28, %s3225_s0 }
 0xa5b   : > { %p3227_p0 = pnand %p3226_p13, %p3632_p8  ;;  %p3232_p11 = por %p3231_p9, %p3230_p10 }
 0xa5d   : > { %p3228_p5 = pneg %p3227_p0 }
 0xa5f   : > { %p3233_p1 = pnand %p3232_p11, %p3228_p5 }
 0xa61   : > { %3236 = shalt.err (!%p3233_p1)
}
 0xa62   : > { %2594 = dma.vmem_to_hbm [thread:$0]  (%p3632_p8), %s2032_s15, 16, %s2034_s27, %s2021_s8  }
 0xa63 PF: > { %s4202_s10 = sld [smem:[#allocation43_spill]]  ;;  %p2611_p4 = scmp.ge.s32.totalorder %s3367_s3, 2 }
 0xa65   : > { %p2604_p3 = pnand %p2611_p4, %p3639_p2 }
 0xa67   : > { %p2605_p7 = pneg %p2604_p3 }
 0xa69   : > { %s2045_s19 = sand.u32 1, %s4202_s10  }
 0xa6a   : > { %s2046_s1 = scalar_lea.sflag [#allocation5], %s2045_s19 }
 0xa6b   : > { %3322 = dma.done.wait (%p2605_p7), %s2046_s1, 16  }
 0xa6c   : > { %3324 = vsyncadd (%p2605_p7), %s2046_s1, 4294967280  ;;  %s62_s3 = sadd.s32 1, %s3367_s3   ;;  %s4204_s5 = sld [smem:[#allocation41_spill]] }
 0xa6d   : > { %p59_p6 = scmp.ge.s32.totalorder %s62_s3, 6   ;;  %s4205_s26 = sld [smem:[#allocation42_spill]] }
 0xa6e   : > { %s4206_s27 = sld [smem:[#allocation48_spill]]  ;;  %s4210_s28 = smov %s3343_s6 }
 0xa6f   : > { %s4207_s16 = sld [smem:[#allocation49_spill]]  ;;  %s4211_s6 = smov %s3347_s2 }
 0xa70   : > { %s4208_s22 = sld [smem:[#allocation46_spill]]  ;;  %s4213_s29 = smov %s3359_s7 }
 0xa71   : > { %s4209_s18 = sld [smem:[#allocation47_spill]]  ;;  %s4214_s0 = smov %s3363_s30 }
 0xa73   :  { %61 = sbr.rel (!%p59_p6) target bundleno = 50 (0x32), region = 346 }
 0xa75   : > { %s4212_s2 = smov %s4207_s16 }
 0xa76   : > { %s4215_s7 = smov %s4208_s22 }
 0xa77   : > { %s4216_s30 = smov %s4209_s18 }
 0xa78   :  { %2051 = vsyncpa [#allocation4], 1 }
 0xa79   :  { %2053 = vsyncpa [#allocation4 + $0x1], 1 }
 0xa7a   :  { %2054 = vsyncpa [#allocation7], 1 }
 0xa7b   :  { %2056 = vsyncpa [#allocation7 + $0x1], 1 }
 0xa7c   :  { %2057 = vsyncpa [#allocation10], 1 }
 0xa7d   :  { %2059 = vsyncpa [#allocation10 + $0x1], 1 }
 0xa7e   :  { %2060 = vsyncpa [#allocation13], 1 }
 0xa7f   :  { %2062 = vsyncpa [#allocation13 + $0x1], 1 }
 0xa80   :  { %2063 = vsyncpa [#allocation16], 1 }
 0xa81   :  { %2065 = vsyncpa [#allocation16 + $0x1], 1 }
 0xa82   :  { %2066 = vsyncpa [#allocation19], 1 }
 0xa83   :  { %2068 = vsyncpa [#allocation19 + $0x1], 1 }
 0xa84   :  { %2069 = vsyncpa [#allocation22], 1 }
 0xa85   :  { %2071 = vsyncpa [#allocation22 + $0x1], 1 }
 0xa86   :  { %2072 = vsyncpa [#allocation25], 1 }
 0xa87   :  { %2074 = vsyncpa [#allocation25 + $0x1], 1 }
 0xa88   :  { %2075 = vsyncpa [#allocation28], 1 }
 0xa89   :  { %2076 = vsyncpa [#allocation5], 1 }
 0xa8a   :  { %2078 = vsyncpa [#allocation5 + $0x1], 1 }

</bundles_post_ra>
